<compile_context>
chip_gen: v5e
topology: v5e:2x2
jax: 0.10.0
libtpu: 0.0.40
codegen_flags: <defaults>
</compile_context>

<pallas_src>
import jax
import jax.numpy as jnp
import numpy as np
from jax.experimental import pallas as pl
from jax.experimental.pallas import tpu as pltpu


def _round_up(x, m):
    return (x + m - 1) // m * m


def _wide_deep_kernel(emb_ref, lin_ref,
                      w1_ref, b1_ref, w2_ref, b2_ref, w3_ref, b3_ref,
                      out_ref):
    """One batch tile of the wide & deep forward.

    emb_ref : (TB, S, D) f32   gathered dnn_embedding rows
    lin_ref : (TB, S)    f32   gathered linear_embedding (dim-1) values
    w1_ref  : (D, H1)    f32   first Linear weight, pre-scaled by 1/S
    b1_ref  : (1, H1), w2_ref : (H1, H2), b2_ref : (1, H2)
    w3_ref  : (1, H2)    f32   final Linear weight as a lane row
    b3_ref  : (1, 1)
    out_ref : (1, TB)    f32   lane-dense logits row for this tile
    """
    # Deep tower. mean(emb, axis=1) @ w1 == sum(emb, axis=1) @ (w1 / S); the
    # 1/S is folded into w1 at trace time, so only a sum is needed here.
    emb_sum = jnp.sum(emb_ref[...], axis=1)                        # (TB, D)
    h = jnp.dot(emb_sum, w1_ref[...],
                preferred_element_type=jnp.float32) + b1_ref[...]
    h = jnp.maximum(h, 0.0)
    # TODO(synk): Dropout is identity (eval mode); training-mode stochastic
    # dropout would need pltpu.prng_seed + pltpu.stateful_bernoulli.
    h = jnp.dot(h, w2_ref[...],
                preferred_element_type=jnp.float32) + b2_ref[...]
    h = jnp.maximum(h, 0.0)
    # Final (H2 -> 1) layer as a VPU multiply + cross-lane reduce: an N=1 MXU
    # matmul would use 1/256 of the MXU columns and produce a lane-1 tile.
    deep = jnp.sum(h * w3_ref[...], axis=-1)                       # (TB,)

    # Wide tower: EmbeddingBag(mode='sum') == per-row sum of the 1-d values.
    wide = jnp.sum(lin_ref[...], axis=-1)                          # (TB,)

    # Lane-dense store: (1, TB) row -> unmasked vst.
    out_ref[...] = (wide + deep)[None, :] + b3_ref[...]


def dnn_linear_combined_forward(tokens, params, *, block_b=None):
    """tokens: (B, S) int32; params: dict of weights. Returns logits (B, 1) f32."""
    B, S = tokens.shape
    dnn_emb = params["dnn_emb"]
    D = dnn_emb.shape[1]
    H1 = params["w1"].shape[1]
    H2 = params["w2"].shape[1]

    # ---- batch tile size ---------------------------------------------------
    # Budget ~8 MiB per pipelined emb buffer (double-buffered -> ~16 MiB),
    # which stays under the 32 MiB scoped-VMEM default on every generation
    # (incl. v7x's 64 MiB physical VMEM) while being big enough to amortize
    # the ~0.35 us/step grid overhead at HBM roofline.
    if block_b is None:
        bytes_per_row = S * _round_up(D, 128) * 4    # lane-padded f32 VMEM rows
        block_b = (8 * 1024 * 1024) // bytes_per_row
        block_b = max(128, min(2048, (block_b // 128) * 128))
    block_b = max(128, _round_up(block_b, 128))
    block_b = min(block_b, _round_up(B, 128))        # don't over-tile tiny B
    b_pad = _round_up(B, block_b)
    num_tiles = b_pad // block_b

    # Pad batch to a whole number of tiles (index 0 is a valid vocab row; the
    # padded rows are dropped after the kernel).
    if b_pad != B:
        tokens = jnp.pad(tokens, ((0, b_pad - B), (0, 0)))

    # Glue: embedding gathers are pure table lookups, done by XLA.
    # TODO(synk): fuse the gather into the kernel (scalar-prefetched tokens +
    # manual DMA from an HBM-resident table) to avoid materializing `emb` in
    # HBM; skipped here because per-row DMAs for small D are descriptor-bound.
    emb = jnp.take(dnn_emb, tokens, axis=0)                        # (b_pad, S, D)
    lin = jnp.take(params["lin_emb"][:, 0], tokens, axis=0)        # (b_pad, S)

    # Trace-time weight prep: fold the mean's 1/S into w1; w3 as a lane row.
    w1_scaled = params["w1"] * jnp.float32(1.0 / S)                # (D, H1)
    w3_row = params["w3"].T                                        # (1, H2)

    resident = lambda i: (0, 0)                                    # weights stay put
    out = pl.pallas_call(
        _wide_deep_kernel,
        out_shape=jax.ShapeDtypeStruct((1, b_pad), jnp.float32),
        grid=(num_tiles,),
        in_specs=[
            pl.BlockSpec((block_b, S, D), lambda i: (i, 0, 0)),    # emb tile
            pl.BlockSpec((block_b, S), lambda i: (i, 0)),          # lin tile
            pl.BlockSpec((D, H1), resident),                       # w1 / S
            pl.BlockSpec((1, H1), resident),                       # b1
            pl.BlockSpec((H1, H2), resident),                      # w2
            pl.BlockSpec((1, H2), resident),                       # b2
            pl.BlockSpec((1, H2), resident),                       # w3 row
            pl.BlockSpec((1, 1), resident),                        # b3
        ],
        out_specs=pl.BlockSpec((1, block_b), lambda i: (0, i)),
        compiler_params=pltpu.CompilerParams(
            dimension_semantics=("parallel",),                     # megacore on v7x
        ),
    )(emb, lin, w1_scaled, params["b1"], params["w2"], params["b2"],
      w3_row, params["b3"])

    return out[0, :B][:, None]                                     # (B, 1)


def init_params(key, vocab_size, embedding_dim=70, dnn_hidden_units=(512, 32)):
    ks = jax.random.split(key, 8)
    h1, h2 = dnn_hidden_units
    return {
        "lin_emb": jax.random.normal(ks[0], (vocab_size, 1), jnp.float32) * 0.1,
        "dnn_emb": jax.random.normal(ks[1], (vocab_size, embedding_dim), jnp.float32) * 0.1,
        "w1": jax.random.normal(ks[2], (embedding_dim, h1), jnp.float32) * 0.05,
        "b1": jax.random.normal(ks[3], (1, h1), jnp.float32) * 0.05,
        "w2": jax.random.normal(ks[4], (h1, h2), jnp.float32) * 0.05,
        "b2": jax.random.normal(ks[5], (1, h2), jnp.float32) * 0.05,
        "w3": jax.random.normal(ks[6], (h2, 1), jnp.float32) * 0.05,
        "b3": jax.random.normal(ks[7], (1, 1), jnp.float32) * 0.05,
    }


def _reference(tokens, params):
    emb = jnp.take(params["dnn_emb"], tokens, axis=0)
    lin = jnp.take(params["lin_emb"][:, 0], tokens, axis=0).sum(axis=1, keepdims=True)
    avg = emb.mean(axis=1)
    h = jnp.maximum(avg @ params["w1"] + params["b1"], 0.0)
    h = jnp.maximum(h @ params["w2"] + params["b2"], 0.0)
    dnn_out = h @ params["w3"] + params["b3"]
    return lin + dnn_out


if __name__ == "__main__":
    key = jax.random.PRNGKey(0)
    vocab_size = 100
    B, S = 2, 8

    pkey, tkey = jax.random.split(key)
    params = init_params(pkey, vocab_size)
    tokens = jax.random.randint(tkey, (B, S), 0, vocab_size, dtype=jnp.int32)

    fwd = jax.jit(dnn_linear_combined_forward)
    logits = fwd(tokens, params)
    jax.block_until_ready(logits)

    ref = _reference(tokens, params)
    assert logits.shape == (B, 1)
    np.testing.assert_allclose(np.asarray(logits), np.asarray(ref),
                               rtol=1e-5, atol=1e-5)
    print("KERNEL_OK")
</pallas_src>

<mosaic_0001>
module attributes {stable_mosaic.version = 11 : i64} {
  func.func @_wide_deep_kernel(%arg0: i32, %arg1: memref<128x8x70xf32, #tpu.memory_space<vmem>>, %arg2: memref<128x8xf32, #tpu.memory_space<vmem>>, %arg3: memref<70x512xf32, #tpu.memory_space<vmem>>, %arg4: memref<1x512xf32, #tpu.memory_space<vmem>>, %arg5: memref<512x32xf32, #tpu.memory_space<vmem>>, %arg6: memref<1x32xf32, #tpu.memory_space<vmem>>, %arg7: memref<1x32xf32, #tpu.memory_space<vmem>>, %arg8: memref<1x1xf32, #tpu.memory_space<vmem>>, %arg9: memref<1x128xf32, #tpu.memory_space<vmem>>) attributes {dimension_semantics = [#tpu.dimension_semantics<parallel>], iteration_bounds = array<i64: 1>, scalar_prefetch = 0 : i64, scratch_operands = 0 : i64, tpu.core_type = #tpu.core_type<tc>, window_params = [{transform_indices = @transform_0, window_bounds = array<i64: 128, 8, 70>}, {transform_indices = @transform_1, window_bounds = array<i64: 128, 8>}, {pipeline_mode = #tpu.pipeline_mode<synchronous>, transform_indices = @transform_2, window_bounds = array<i64: 70, 512>}, {pipeline_mode = #tpu.pipeline_mode<synchronous>, transform_indices = @transform_3, window_bounds = array<i64: 1, 512>}, {pipeline_mode = #tpu.pipeline_mode<synchronous>, transform_indices = @transform_4, window_bounds = array<i64: 512, 32>}, {pipeline_mode = #tpu.pipeline_mode<synchronous>, transform_indices = @transform_5, window_bounds = array<i64: 1, 32>}, {pipeline_mode = #tpu.pipeline_mode<synchronous>, transform_indices = @transform_6, window_bounds = array<i64: 1, 32>}, {pipeline_mode = #tpu.pipeline_mode<synchronous>, transform_indices = @transform_7, window_bounds = array<i64: 1, 1>}, {transform_indices = @transform_8, window_bounds = array<i64: 1, 128>}]} {
    %c0 = arith.constant 0 : index
    %c0_0 = arith.constant 0 : index
    %c0_1 = arith.constant 0 : index
    %0 = vector.load %arg1[%c0, %c0_0, %c0_1] : memref<128x8x70xf32, #tpu.memory_space<vmem>>, vector<128x8x70xf32>
    %cst = arith.constant dense<0.000000e+00> : vector<128x70xf32>
    %1 = vector.multi_reduction <add>, %0, %cst [1] : vector<128x8x70xf32> to vector<128x70xf32>
    %c0_2 = arith.constant 0 : index
    %c0_3 = arith.constant 0 : index
    %2 = vector.load %arg3[%c0_2, %c0_3] : memref<70x512xf32, #tpu.memory_space<vmem>>, vector<70x512xf32>
    %cst_4 = arith.constant dense<0.000000e+00> : vector<128x512xf32>
    %3 = tpu.matmul %1, %2, %cst_4 {dimension_numbers = #tpu.dot_dimension_numbers<[1], [0], [0], [1], [0, 0, 1, 1], [], []>} : vector<128x70xf32>, vector<70x512xf32>, vector<128x512xf32> -> vector<128x512xf32>
    %c0_5 = arith.constant 0 : index
    %c0_6 = arith.constant 0 : index
    %4 = vector.load %arg4[%c0_5, %c0_6] : memref<1x512xf32, #tpu.memory_space<vmem>>, vector<1x512xf32>
    %5 = vector.broadcast %4 : vector<1x512xf32> to vector<128x512xf32>
    %6 = arith.addf %3, %5 : vector<128x512xf32>
    %cst_7 = arith.constant 0.000000e+00 : f32
    %7 = vector.broadcast %cst_7 : f32 to vector<128x512xf32>
    %8 = arith.maximumf %6, %7 : vector<128x512xf32>
    %c0_8 = arith.constant 0 : index
    %c0_9 = arith.constant 0 : index
    %9 = vector.load %arg5[%c0_8, %c0_9] : memref<512x32xf32, #tpu.memory_space<vmem>>, vector<512x32xf32>
    %cst_10 = arith.constant dense<0.000000e+00> : vector<128x32xf32>
    %10 = tpu.matmul %8, %9, %cst_10 {dimension_numbers = #tpu.dot_dimension_numbers<[1], [0], [0], [1], [0, 0, 1, 1], [], []>} : vector<128x512xf32>, vector<512x32xf32>, vector<128x32xf32> -> vector<128x32xf32>
    %c0_11 = arith.constant 0 : index
    %c0_12 = arith.constant 0 : index
    %11 = vector.load %arg6[%c0_11, %c0_12] : memref<1x32xf32, #tpu.memory_space<vmem>>, vector<1x32xf32>
    %12 = vector.broadcast %11 : vector<1x32xf32> to vector<128x32xf32>
    %13 = arith.addf %10, %12 : vector<128x32xf32>
    %cst_13 = arith.constant 0.000000e+00 : f32
    %14 = vector.broadcast %cst_13 : f32 to vector<128x32xf32>
    %15 = arith.maximumf %13, %14 : vector<128x32xf32>
    %c0_14 = arith.constant 0 : index
    %c0_15 = arith.constant 0 : index
    %16 = vector.load %arg7[%c0_14, %c0_15] : memref<1x32xf32, #tpu.memory_space<vmem>>, vector<1x32xf32>
    %17 = vector.broadcast %16 : vector<1x32xf32> to vector<128x32xf32>
    %18 = arith.mulf %15, %17 : vector<128x32xf32>
    %cst_16 = arith.constant dense<0.000000e+00> : vector<128xf32>
    %19 = vector.multi_reduction <add>, %18, %cst_16 [1] : vector<128x32xf32> to vector<128xf32>
    %c0_17 = arith.constant 0 : index
    %c0_18 = arith.constant 0 : index
    %20 = vector.load %arg2[%c0_17, %c0_18] : memref<128x8xf32, #tpu.memory_space<vmem>>, vector<128x8xf32>
    %cst_19 = arith.constant dense<0.000000e+00> : vector<128xf32>
    %21 = vector.multi_reduction <add>, %20, %cst_19 [1] : vector<128x8xf32> to vector<128xf32>
    %22 = arith.addf %21, %19 : vector<128xf32>
    %23 = vector.shape_cast %22 : vector<128xf32> to vector<1x128xf32>
    %c0_20 = arith.constant 0 : index
    %c0_21 = arith.constant 0 : index
    %24 = vector.load %arg8[%c0_20, %c0_21] : memref<1x1xf32, #tpu.memory_space<vmem>>, vector<1x1xf32>
    %25 = vector.broadcast %24 : vector<1x1xf32> to vector<1x128xf32>
    %26 = arith.addf %23, %25 : vector<1x128xf32>
    %c0_22 = arith.constant 0 : index
    %c0_23 = arith.constant 0 : index
    %27 = vector.load %arg9[%c0_22, %c0_23] : memref<1x128xf32, #tpu.memory_space<vmem>>, vector<1x128xf32>
    tpu.vector_store %arg9[%c0_22, %c0_23], %26 {strides = array<i32>} : memref<1x128xf32, #tpu.memory_space<vmem>>, vector<1x128xf32>,
    return
  }
  func.func @transform_0(%arg0: i32) -> (i32, i32, i32) {
    %c0_i32 = arith.constant 0 : i32
    %c0_i32_0 = arith.constant 0 : i32
    %c0_i32_1 = arith.constant 0 : i32
    return %arg0, %c0_i32, %c0_i32_0 : i32, i32, i32
  }
  func.func @transform_1(%arg0: i32) -> (i32, i32) {
    %c0_i32 = arith.constant 0 : i32
    %c0_i32_0 = arith.constant 0 : i32
    return %arg0, %c0_i32 : i32, i32
  }
  func.func @transform_2(%arg0: i32) -> (i32, i32) {
    %c0_i32 = arith.constant 0 : i32
    %c0_i32_0 = arith.constant 0 : i32
    %c0_i32_1 = arith.constant 0 : i32
    return %c0_i32, %c0_i32_0 : i32, i32
  }
  func.func @transform_3(%arg0: i32) -> (i32, i32) {
    %c0_i32 = arith.constant 0 : i32
    %c0_i32_0 = arith.constant 0 : i32
    %c0_i32_1 = arith.constant 0 : i32
    return %c0_i32, %c0_i32_0 : i32, i32
  }
  func.func @transform_4(%arg0: i32) -> (i32, i32) {
    %c0_i32 = arith.constant 0 : i32
    %c0_i32_0 = arith.constant 0 : i32
    %c0_i32_1 = arith.constant 0 : i32
    return %c0_i32, %c0_i32_0 : i32, i32
  }
  func.func @transform_5(%arg0: i32) -> (i32, i32) {
    %c0_i32 = arith.constant 0 : i32
    %c0_i32_0 = arith.constant 0 : i32
    %c0_i32_1 = arith.constant 0 : i32
    return %c0_i32, %c0_i32_0 : i32, i32
  }
  func.func @transform_6(%arg0: i32) -> (i32, i32) {
    %c0_i32 = arith.constant 0 : i32
    %c0_i32_0 = arith.constant 0 : i32
    %c0_i32_1 = arith.constant 0 : i32
    return %c0_i32, %c0_i32_0 : i32, i32
  }
  func.func @transform_7(%arg0: i32) -> (i32, i32) {
    %c0_i32 = arith.constant 0 : i32
    %c0_i32_0 = arith.constant 0 : i32
    %c0_i32_1 = arith.constant 0 : i32
    return %c0_i32, %c0_i32_0 : i32, i32
  }
  func.func @transform_8(%arg0: i32) -> (i32, i32) {
    %c0_i32 = arith.constant 0 : i32
    %c0_i32_0 = arith.constant 0 : i32
    return %c0_i32, %arg0 : i32, i32
  }
}

</mosaic_0001>

<bundles_post_ra>
// kernel: dnn_linear_combined_forward.1
= control target key start
LH: loop header
LB: loop body
LE: loop exit
PB: predicated region body
PF: predicated region fallthrough
CT: control target
= control target key end

     0   :  { %vm1381_vm0 = vcmask 1045504   ;;  %vm159_vm1 = vcmask 572416   ;;  %vm1230_vm2 = vcmask 1041409   ;;  %vm1232_vm3 = vcmask 1042434   ;;  %s3712_s2 = inlined_call_operand.vmem [shape: f32[70,512], index: 2, kind: input, shape index: {}]   ;;  %s3713_s0 = inlined_call_operand.vmem [shape: f32[128,8,70], index: 0, kind: input, shape index: {}]   ;;  %s3714_s4 = inlined_call_operand.vmem [shape: f32[512,32], index: 4, kind: input, shape index: {}]   ;;  %s3715_s3 = inlined_call_operand.vmem [shape: f32[1,512], index: 3, kind: input, shape index: {}]   ;;  %s3716_s5 = inlined_call_operand.vmem [shape: f32[1,32], index: 5, kind: input, shape index: {}]   ;;  %s3717_s6 = inlined_call_operand.vmem [shape: f32[1,32], index: 6, kind: input, shape index: {}]   ;;  %s3718_s1 = inlined_call_operand.vmem [shape: f32[128,8], index: 1, kind: input, shape index: {}]   ;;  %s3719_s7 = inlined_call_operand.<no memory space> [shape: f32[1,1], index: 7, kind: input, shape index: {}]   ;;  %s3720_s8 = inlined_call_operand.vmem [shape: f32[1,128], index: 8, kind: output, shape index: {}]  }
   0x1   :  { %v1090_v0 = vld [vmem:[%s3712_s2 + $0x110] sm:$0x3f]  ;;  %v1091_v2 = vld [vmem:[%s3712_s2 + $0x118] sm:$0x3f]  ;;  %v1088_v6 = vld [vmem:[%s3712_s2 + $0x100] sm:$0x3f] }
   0x2   :  { %v1086_v1 = vld [vmem:[%s3712_s2 + $0xf0] sm:$0xff]  ;;  %2354 = vmatpush.msk.msra.mxu2 %vm1381_vm0, %v1090_v0  ;;  %2371 = vmatpush.msk.msra.mxu3 %vm1381_vm0, %v1091_v2  ;;  %v1087_v3 = vld [vmem:[%s3712_s2 + $0xf8] sm:$0xff]  ;;  %v1084_v7 = vld [vmem:[%s3712_s2 + $0xe0] sm:$0xff]  ;;  %vm1234_vm4 = vcmask 1043459   ;;  %vm1236_vm5 = vcmask 1044484   ;;  %vm1238_vm6 = vcmask 1045509  }
   0x3   :  { %v1082_v4 = vld [vmem:[%s3712_s2 + $0xd0] sm:$0xff]  ;;  %v1083_v5 = vld [vmem:[%s3712_s2 + $0xd8] sm:$0xff]  ;;  %v1089_v8 = vld [vmem:[%s3712_s2 + $0x108] sm:$0x3f]  ;;  %2320 = vmatpush.msk.msra.mxu0 %vm1381_vm0, %v1088_v6  ;;  %vm1240_vm7 = vcmask 1046534   ;;  %vm1242_vm8 = vcmask 1047559  }
   0x4   :  { %1532 = vmatpush.msra.mxu2 %v1086_v1  ;;  %1597 = vmatpush.msra.mxu3 %v1087_v3  ;;  %v1078_v9 = vld [vmem:[%s3712_s2 + $0xb0] sm:$0xff]  ;;  %v1079_v10 = vld [vmem:[%s3712_s2 + $0xb8] sm:$0xff]  ;;  %v1080_v12 = vld [vmem:[%s3712_s2 + $0xc0] sm:$0xff]  ;;  %vm2147_vm9 = vcmask 64512   ;;  %vm2082_vm10 = vcmask 261120   ;;  %vm2256_vm11 = vcmask 130112  }
   0x5   :  { %2337 = vmatpush.msk.msra.mxu1 %vm1381_vm0, %v1089_v8  ;;  %v1074_v11 = vld [vmem:[%s3712_s2 + $0x90] sm:$0xff]  ;;  %v1085_v13 = vld [vmem:[%s3712_s2 + $0xe8] sm:$0xff]  ;;  %1402 = vmatpush.msra.mxu0 %v1084_v7  ;;  %v1075_v15 = vld [vmem:[%s3712_s2 + $0x98] sm:$0xff]  ;;  %vm2260_vm12 = vcmask 195712   ;;  %vm2264_vm13 = vcmask 261312   ;;  %vm2268_vm14 = vcmask 326912  }
   0x6   :  { %1533 = vmatpush.msra.mxu2 %v1082_v4  ;;  %1598 = vmatpush.msra.mxu3 %v1083_v5  ;;  %v1070_v14 = vld [vmem:[%s3712_s2 + $0x70] sm:$0xff]  ;;  %v1081_v16 = vld [vmem:[%s3712_s2 + $0xc8] sm:$0xff]  ;;  %v1071_v17 = vld [vmem:[%s3712_s2 + $0x78] sm:$0xff]  ;;  %vm2272_vm15 = vcmask 392512   ;;  %vm2276_vm0 = vcmask 458112  }
   0x7   :  { %1467 = vmatpush.msra.mxu1 %v1085_v13  ;;  %v1076_v18 = vld [vmem:[%s3712_s2 + $0xa0] sm:$0xff]  ;;  %v1077_v19 = vld [vmem:[%s3712_s2 + $0xa8] sm:$0xff]  ;;  %1403 = vmatpush.msra.mxu0 %v1080_v12  ;;  %v1066_v20 = vld [vmem:[%s3712_s2 + $0x50] sm:$0xff] }
   0x8   :  { %1534 = vmatpush.msra.mxu2 %v1078_v9  ;;  %1599 = vmatpush.msra.mxu3 %v1079_v10  ;;  %v1067_v21 = vld [vmem:[%s3712_s2 + $0x58] sm:$0xff]  ;;  %v1072_v22 = vld [vmem:[%s3712_s2 + $0x80] sm:$0xff]  ;;  %v32_v24 = vld [vmem:[%s3713_s0 + $0x8] sm:$0xff] }
   0x9   :  { %1468 = vmatpush.msra.mxu1 %v1081_v16  ;;  %v31_v23 = vld [vmem:[%s3713_s0] sm:$0xff]  ;;  %v33_v25 = vld [vmem:[%s3713_s0 + $0x10] sm:$0xff]  ;;  %v34_v26 = vld [vmem:[%s3713_s0 + $0x18] sm:$0xff]  ;;  %1404 = vmatpush.msra.mxu0 %v1076_v18  ;;  %v167_v32 = vsel %vm159_vm1, %v32_v24, 0.0 }
   0xa   :  { %1535 = vmatpush.msra.mxu2 %v1074_v11  ;;  %1600 = vmatpush.msra.mxu3 %v1075_v15  ;;  %v160_v27 = vsel %vm159_vm1, %v31_v23, 0.0  ;;  %v35_v28 = vld [vmem:[%s3713_s0 + $0x20] sm:$0xff]  ;;  %v36_v29 = vld [vmem:[%s3713_s0 + $0x28] sm:$0xff]  ;;  %v37_v30 = vld [vmem:[%s3713_s0 + $0x30] sm:$0xff]  ;;  %v174_v33 = vsel %vm159_vm1, %v33_v25, 0.0  ;;  %v168_v35 = vrot.slane %v167_v32, 4 }
   0xb   :  { %1469 = vmatpush.msra.mxu1 %v1077_v19  ;;  %v161_v31 = vrot.slane %v160_v27, 4  ;;  %v1062_v34 = vld [vmem:[%s3712_s2 + $0x30] sm:$0xff]  ;;  %v175_v36 = vrot.slane %v174_v33, 4  ;;  %v181_v37 = vsel %vm159_vm1, %v34_v26, 0.0  ;;  %v188_v38 = vsel %vm159_vm1, %v35_v28, 0.0  ;;  %v1068_v39 = vld [vmem:[%s3712_s2 + $0x60] sm:$0xff]  ;;  %1405 = vmatpush.msra.mxu0 %v1072_v22 }
   0xc   :  { %1536 = vmatpush.msra.mxu2 %v1070_v14  ;;  %1601 = vmatpush.msra.mxu3 %v1071_v17  ;;  %v1063_v40 = vld [vmem:[%s3712_s2 + $0x38] sm:$0xff]  ;;  %v182_v43 = vrot.slane %v181_v37, 4  ;;  %v189_v44 = vrot.slane %v188_v38, 4  ;;  %v195_v45 = vsel %vm159_vm1, %v36_v29, 0.0  ;;  %v1073_v46 = vld [vmem:[%s3712_s2 + $0x88] sm:$0xff]  ;;  %v169_v47 = vadd.f32 %v168_v35, %v167_v32  ;;  %v1064_v51 = vld [vmem:[%s3712_s2 + $0x40] sm:$0xff] }
   0xd   :  { %v38_v41 = vld [vmem:[%s3713_s0 + $0x38] sm:$0xff]  ;;  %v162_v42 = vadd.f32 %v161_v31, %v160_v27  ;;  %v176_v48 = vadd.f32 %v175_v36, %v174_v33  ;;  %v196_v49 = vrot.slane %v195_v45, 4  ;;  %v202_v50 = vsel %vm159_vm1, %v37_v30, 0.0  ;;  %v1069_v52 = vld [vmem:[%s3712_s2 + $0x68] sm:$0xff]  ;;  %v1058_v53 = vld [vmem:[%s3712_s2 + $0x10] sm:$0xff]  ;;  %1406 = vmatpush.msra.mxu0 %v1068_v39  ;;  %1470 = vmatpush.msra.mxu1 %v1073_v46 }
   0xe   :  { %1537 = vmatpush.msra.mxu2 %v1066_v20  ;;  %1602 = vmatpush.msra.mxu3 %v1067_v21  ;;  %v183_v55 = vadd.f32 %v182_v43, %v181_v37  ;;  %v190_v56 = vadd.f32 %v189_v44, %v188_v38  ;;  %v203_v57 = vrot.slane %v202_v50, 4  ;;  %v1059_v58 = vld [vmem:[%s3712_s2 + $0x18] sm:$0xff]  ;;  %v170_v59 = vrot.slane %v169_v47, 2  ;;  %v1060_v63 = vld [vmem:[%s3712_s2 + $0x20] sm:$0xff]  ;;  %v1065_v0 = vld [vmem:[%s3712_s2 + $0x48] sm:$0xff] }
   0xf   :  { %v163_v54 = vrot.slane %v162_v42, 2  ;;  %v177_v60 = vrot.slane %v176_v48, 2  ;;  %v197_v61 = vadd.f32 %v196_v49, %v195_v45  ;;  %v209_v62 = vsel %vm159_vm1, %v38_v41, 0.0  ;;  %1407 = vmatpush.msra.mxu0 %v1064_v51  ;;  %1471 = vmatpush.msra.mxu1 %v1069_v52  ;;  %v1056_v9 = vld [vmem:[%s3712_s2] sm:$0xff]  ;;  %v1061_v10 = vld [vmem:[%s3712_s2 + $0x28] sm:$0xff]  ;;  %v1765_v11 = vld [vmem:[%s3714_s4 + $0x178] sm:$0xff] }
  0x10   :  { %1538 = vmatpush.msra.mxu2 %v1062_v34  ;;  %1603 = vmatpush.msra.mxu3 %v1063_v40  ;;  %v184_v2 = vrot.slane %v183_v55, 2  ;;  %v191_v3 = vrot.slane %v190_v56, 2  ;;  %v204_v4 = vadd.f32 %v203_v57, %v202_v50  ;;  %v171_v5 = vadd.f32 %v170_v59, %v169_v47  ;;  %v1733_v16 = vld [vmem:[%s3714_s4 + $0x78] sm:$0xff]  ;;  %v39_v22 = vld [vmem:[%s3713_s0 + $0x40] sm:$0xff]  ;;  %v1057_v23 = vld [vmem:[%s3712_s2 + $0x8] sm:$0xff] }
  0x11   :  { %v164_v1 = vadd.f32 %v163_v54, %v162_v42  ;;  %v178_v6 = vadd.f32 %v177_v60, %v176_v48  ;;  %v198_v7 = vrot.slane %v197_v61, 2  ;;  %v210_v8 = vrot.slane %v209_v62, 4  ;;  %1408 = vmatpush.msra.mxu0 %v1060_v63  ;;  %1472 = vmatpush.msra.mxu1 %v1065_v0  ;;  %v1781_v17 = vld [vmem:[%s3714_s4 + $0x1f8] sm:$0xff]  ;;  %v40_v33 = vld [vmem:[%s3713_s0 + $0x48] sm:$0xff]  ;;  %v41_v34 = vld [vmem:[%s3713_s0 + $0x50] sm:$0xff] }
  0x12   :  { %1539 = vmatpush.msra.mxu2 %v1058_v53  ;;  %1604 = vmatpush.msra.mxu3 %v1059_v58  ;;  %v185_v13 = vadd.f32 %v184_v2, %v183_v55  ;;  %v192_v14 = vadd.f32 %v191_v3, %v190_v56  ;;  %v205_v15 = vrot.slane %v204_v4, 2  ;;  %v172_v18 = vrot.slane %v171_v5, 1  ;;  %v1749_v28 = vld [vmem:[%s3714_s4 + $0xf8] sm:$0xff]  ;;  %v43_v43 = vld [vmem:[%s3713_s0 + $0x60] sm:$0xff]  ;;  %v44_v54 = vld [vmem:[%s3713_s0 + $0x68] sm:$0xff] }
  0x13   :  { %v165_v12 = vrot.slane %v164_v1, 1  ;;  %v179_v19 = vrot.slane %v178_v6, 1  ;;  %v199_v20 = vadd.f32 %v198_v7, %v197_v61  ;;  %v211_v21 = vadd.f32 %v210_v8, %v209_v62  ;;  %1409 = vmatpush.msra.mxu0 %v1056_v9  ;;  %1473 = vmatpush.msra.mxu1 %v1061_v10  ;;  %v42_v42 = vld [vmem:[%s3713_s0 + $0x58] sm:$0xff]  ;;  %v45_v63 = vld [vmem:[%s3713_s0 + $0x70] sm:$0xff] }
  0x14   :  { %1916 = vmatpush.msrb.mxu2 %v1765_v11  ;;  %1981 = vmatpush.msrb.mxu3 %v1781_v17  ;;  %v186_v25 = vrot.slane %v185_v13, 1  ;;  %v193_v26 = vrot.slane %v192_v14, 1  ;;  %v206_v27 = vadd.f32 %v205_v15, %v204_v4  ;;  %v173_v29 = vadd.f32 %v172_v18, %v171_v5  ;;  %v46_v0 = vld [vmem:[%s3713_s0 + $0x78] sm:$0xff] }
  0x15   :  { %v166_v24 = vadd.f32 %v165_v12, %v164_v1  ;;  %v180_v30 = vadd.f32 %v179_v19, %v178_v6  ;;  %v200_v31 = vrot.slane %v199_v20, 1  ;;  %v212_v32 = vrot.slane %v211_v21, 2  ;;  %1786 = vmatpush.msrb.mxu0 %v1733_v16  ;;  %1474 = vmatpush.msra.mxu1 %v1057_v23  ;;  %v47_v16 = vld [vmem:[%s3713_s0 + $0x80] sm:$0xff]  ;;  %v1780_v23 = vld [vmem:[%s3714_s4 + $0x1f0] sm:$0xff] }
  0x16   :  { %v187_v35 = vadd.f32 %v186_v25, %v185_v13  ;;  %v194_v36 = vadd.f32 %v193_v26, %v192_v14  ;;  %v207_v37 = vrot.slane %v206_v27, 1  ;;  %v216_v38 = vsel %vm159_vm1, %v39_v22, 0.0  ;;  %v1732_v22 = vld [vmem:[%s3714_s4 + $0x70] sm:$0xff]  ;;  %1982 = vmatpush.msrb.mxu3 %v1780_v23 }
  0x17   :  { %v201_v39 = vadd.f32 %v200_v31, %v199_v20  ;;  %v213_v40 = vadd.f32 %v212_v32, %v211_v21  ;;  %v1231_v41 = vsel %vm1230_vm2, %v173_v29, %v166_v24  ;;  %v217_v44 = vrot.slane %v216_v38, 4  ;;  %1851 = vmatpush.msrb.mxu1 %v1749_v28  ;;  %v1764_v21 = vld [vmem:[%s3714_s4 + $0x170] sm:$0xff]  ;;  %1787 = vmatpush.msrb.mxu0 %v1732_v22 }
  0x18   :  { %v208_v45 = vadd.f32 %v207_v37, %v206_v27  ;;  %v1233_v46 = vsel %vm1232_vm3, %v180_v30, %v1231_v41  ;;  %v223_v47 = vsel %vm159_vm1, %v40_v33, 0.0  ;;  %v230_v48 = vsel %vm159_vm1, %v41_v34, 0.0  ;;  %1917 = vmatpush.msrb.mxu2 %v1764_v21  ;;  %v1748_v28 = vld [vmem:[%s3714_s4 + $0xf0] sm:$0xff]  ;;  %v48_v41 = vld [vmem:[%s3713_s0 + $0x88] sm:$0xff] }
  0x19   :  { %v214_v49 = vrot.slane %v213_v40, 1  ;;  %v1235_v50 = vsel %vm1234_vm4, %v187_v35, %v1233_v46  ;;  %v218_v51 = vadd.f32 %v217_v44, %v216_v38  ;;  %v224_v52 = vrot.slane %v223_v47, 4  ;;  %1852 = vmatpush.msrb.mxu1 %v1748_v28 }
  0x1a   :  { %v1237_v53 = vsel %vm1236_vm5, %v194_v36, %v1235_v50  ;;  %v231_v55 = vrot.slane %v230_v48, 4  ;;  %v237_v56 = vsel %vm159_vm1, %v42_v42, 0.0  ;;  %v244_v57 = vsel %vm159_vm1, %v43_v43, 0.0 }
  0x1b   :  { %v215_v58 = vadd.f32 %v214_v49, %v213_v40  ;;  %v1239_v59 = vsel %vm1238_vm6, %v201_v39, %v1237_v53  ;;  %v219_v60 = vrot.slane %v218_v51, 2  ;;  %v225_v61 = vadd.f32 %v224_v52, %v223_v47  ;;  %v50_v53 = vld [vmem:[%s3713_s0 + $0x98] sm:$0xff] }
  0x1c   :  { %v1241_v62 = vsel %vm1240_vm7, %v208_v45, %v1239_v59  ;;  %v232_v1 = vadd.f32 %v231_v55, %v230_v48  ;;  %v238_v2 = vrot.slane %v237_v56, 4  ;;  %v245_v3 = vrot.slane %v244_v57, 4  ;;  %v49_v45 = vld [vmem:[%s3713_s0 + $0x90] sm:$0xff] }
  0x1d   :  { %v1243_v4 = vsel %vm1242_vm8, %v215_v58, %v1241_v62  ;;  %v220_v5 = vadd.f32 %v219_v60, %v218_v51  ;;  %v226_v6 = vrot.slane %v225_v61, 2  ;;  %v251_v7 = vsel %vm159_vm1, %v44_v54, 0.0 }
  0x1e   :  { %2355 = vmatmul.msk.f32.vlgmr.msra.gmra.mxu2 %vm159_vm1, %v1243_v4  ;;  %2372 = vmatmul.msk.f32.vlgmr.msra.gmra.mxu3 %vm159_vm1, %v1243_v4  ;;  %v233_v8 = vrot.slane %v232_v1, 2  ;;  %v239_v9 = vadd.f32 %v238_v2, %v237_v56  ;;  %v246_v10 = vadd.f32 %v245_v3, %v244_v57  ;;  %v252_v11 = vrot.slane %v251_v7, 4 }
  0x1f   :  { %2321 = vmatmul.msk.f32.vlgmr.msra.gmra.mxu0 %vm159_vm1, %v1243_v4  ;;  %v221_v12 = vrot.slane %v220_v5, 1  ;;  %v227_v13 = vadd.f32 %v226_v6, %v225_v61  ;;  %v258_v14 = vsel %vm159_vm1, %v45_v63, 0.0  ;;  %v265_v15 = vsel %vm159_vm1, %v46_v0, 0.0  ;;  %2338 = vmatmul.msk.f32.vlgmr.msra.gmra.mxu1 %vm159_vm1, %v1243_v4  ;;  %v51_v63 = vld [vmem:[%s3713_s0 + $0xa0] sm:$0xff]  ;;  %v52_v0 = vld [vmem:[%s3713_s0 + $0xa8] sm:$0xff] }
  0x20   :  { %v234_v17 = vadd.f32 %v233_v8, %v232_v1  ;;  %v240_v18 = vrot.slane %v239_v9, 2  ;;  %v247_v19 = vrot.slane %v246_v10, 2  ;;  %v253_v20 = vadd.f32 %v252_v11, %v251_v7 }
  0x21   :  { %v222_v24 = vadd.f32 %v221_v12, %v220_v5  ;;  %v228_v25 = vrot.slane %v227_v13, 1  ;;  %v259_v26 = vrot.slane %v258_v14, 4  ;;  %v266_v27 = vrot.slane %v265_v15, 4 }
  0x22   :  { %v235_v29 = vrot.slane %v234_v17, 1  ;;  %v241_v30 = vadd.f32 %v240_v18, %v239_v9  ;;  %v248_v31 = vadd.f32 %v247_v19, %v246_v10  ;;  %v254_v32 = vrot.slane %v253_v20, 2  ;;  %v53_v10 = vld [vmem:[%s3713_s0 + $0xb0] sm:$0xff] }
  0x23   :  { %v229_v33 = vadd.f32 %v228_v25, %v227_v13  ;;  %v260_v34 = vadd.f32 %v259_v26, %v258_v14  ;;  %v267_v35 = vadd.f32 %v266_v27, %v265_v15  ;;  %v272_v36 = vsel %vm159_vm1, %v47_v16, 0.0  ;;  %v54_v16 = vld [vmem:[%s3713_s0 + $0xb8] sm:$0xff]  ;;  %v1763_v25 = vld [vmem:[%s3714_s4 + $0x168] sm:$0xff] }
  0x24   :  { %v236_v37 = vadd.f32 %v235_v29, %v234_v17  ;;  %v242_v38 = vrot.slane %v241_v30, 1  ;;  %v249_v39 = vrot.slane %v248_v31, 1  ;;  %v255_v40 = vadd.f32 %v254_v32, %v253_v20  ;;  %v1731_v26 = vld [vmem:[%s3714_s4 + $0x68] sm:$0xff]  ;;  %1918 = vmatpush.msrb.mxu2 %v1763_v25 }
  0x25   :  { %v261_v42 = vrot.slane %v260_v34, 2  ;;  %v268_v43 = vrot.slane %v267_v35, 2  ;;  %v1244_v44 = vsel %vm1230_vm2, %v229_v33, %v222_v24  ;;  %v273_v46 = vrot.slane %v272_v36, 4  ;;  %v55_v24 = vld [vmem:[%s3713_s0 + $0xc0] sm:$0xff]  ;;  %v1747_v32 = vld [vmem:[%s3714_s4 + $0xe8] sm:$0xff]  ;;  %1788 = vmatpush.msrb.mxu0 %v1731_v26 }
  0x26   :  { %v243_v47 = vadd.f32 %v242_v38, %v241_v30  ;;  %v250_v48 = vadd.f32 %v249_v39, %v248_v31  ;;  %v256_v49 = vrot.slane %v255_v40, 1  ;;  %v1245_v50 = vsel %vm1232_vm3, %v236_v37, %v1244_v44  ;;  %v1779_v31 = vld [vmem:[%s3714_s4 + $0x1e8] sm:$0xff]  ;;  %1853 = vmatpush.msrb.mxu1 %v1747_v32 }
  0x27   :  { %v262_v51 = vadd.f32 %v261_v42, %v260_v34  ;;  %v269_v52 = vadd.f32 %v268_v43, %v267_v35  ;;  %v274_v54 = vadd.f32 %v273_v46, %v272_v36  ;;  %v279_v55 = vsel %vm159_vm1, %v48_v41, 0.0  ;;  %1983 = vmatpush.msrb.mxu3 %v1779_v31 }
  0x28   :  { %v257_v56 = vadd.f32 %v256_v49, %v255_v40  ;;  %v1246_v57 = vsel %vm1234_vm4, %v243_v47, %v1245_v50  ;;  %v280_v58 = vrot.slane %v279_v55, 4  ;;  %v286_v59 = vsel %vm159_vm1, %v49_v45, 0.0 }
  0x29   :  { %v263_v60 = vrot.slane %v262_v51, 1  ;;  %v270_v61 = vrot.slane %v269_v52, 1  ;;  %v1247_v62 = vsel %vm1236_vm5, %v250_v48, %v1246_v57  ;;  %v275_v1 = vrot.slane %v274_v54, 2  ;;  %v56_v48 = vld [vmem:[%s3713_s0 + $0xc8] sm:$0xff]  ;;  %v57_v57 = vld [vmem:[%s3713_s0 + $0xd0] sm:$0xff] }
  0x2a   :  { %v1248_v2 = vsel %vm1238_vm6, %v257_v56, %v1247_v62  ;;  %v281_v3 = vadd.f32 %v280_v58, %v279_v55  ;;  %v287_v4 = vrot.slane %v286_v59, 4  ;;  %v293_v5 = vsel %vm159_vm1, %v50_v53, 0.0 }
  0x2b   :  { %v264_v6 = vadd.f32 %v263_v60, %v262_v51  ;;  %v271_v7 = vadd.f32 %v270_v61, %v269_v52  ;;  %v276_v8 = vadd.f32 %v275_v1, %v274_v54  ;;  %v294_v9 = vrot.slane %v293_v5, 4 }
  0x2c   :  { %v282_v11 = vrot.slane %v281_v3, 2  ;;  %v288_v12 = vadd.f32 %v287_v4, %v286_v59  ;;  %v300_v13 = vsel %vm159_vm1, %v51_v63, 0.0  ;;  %v307_v14 = vsel %vm159_vm1, %v52_v0, 0.0 }
  0x2d   :  { %v1249_v15 = vsel %vm1240_vm7, %v264_v6, %v1248_v2  ;;  %v277_v17 = vrot.slane %v276_v8, 1  ;;  %v295_v18 = vadd.f32 %v294_v9, %v293_v5  ;;  %v301_v19 = vrot.slane %v300_v13, 4  ;;  %v58_v2 = vld [vmem:[%s3713_s0 + $0xd8] sm:$0xff] }
  0x2e   :  { %v1250_v20 = vsel %vm1242_vm8, %v271_v7, %v1249_v15  ;;  %v283_v21 = vadd.f32 %v282_v11, %v281_v3  ;;  %v289_v22 = vrot.slane %v288_v12, 2  ;;  %v308_v23 = vrot.slane %v307_v14, 4  ;;  %v60_v11 = vld [vmem:[%s3713_s0 + $0xe8] sm:$0xff] }
  0x2f   :  { %2356 = vmatmul.msk.f32.gmra.mxu2 %vm159_vm1, %v1250_v20  ;;  %2373 = vmatmul.msk.f32.gmra.mxu3 %vm159_vm1, %v1250_v20  ;;  %v278_v27 = vadd.f32 %v277_v17, %v276_v8  ;;  %v296_v28 = vrot.slane %v295_v18, 2  ;;  %v302_v29 = vadd.f32 %v301_v19, %v300_v13  ;;  %v314_v30 = vsel %vm159_vm1, %v53_v10, 0.0  ;;  %v59_v10 = vld [vmem:[%s3713_s0 + $0xe0] sm:$0xff]  ;;  %v61_v19 = vld [vmem:[%s3713_s0 + $0xf0] sm:$0xff] }
  0x30   :  { %2322 = vmatmul.msk.f32.gmra.mxu0 %vm159_vm1, %v1250_v20  ;;  %v284_v33 = vrot.slane %v283_v21, 1  ;;  %v290_v34 = vadd.f32 %v289_v22, %v288_v12  ;;  %v309_v35 = vadd.f32 %v308_v23, %v307_v14  ;;  %v315_v36 = vrot.slane %v314_v30, 4  ;;  %2339 = vmatmul.msk.f32.gmra.mxu1 %vm159_vm1, %v1250_v20 }
  0x31   :  { %v297_v37 = vadd.f32 %v296_v28, %v295_v18  ;;  %v303_v38 = vrot.slane %v302_v29, 2  ;;  %v321_v39 = vsel %vm159_vm1, %v54_v16, 0.0  ;;  %v328_v40 = vsel %vm159_vm1, %v55_v24, 0.0  ;;  %v62_v28 = vld [vmem:[%s3713_s0 + $0xf8] sm:$0xff] }
  0x32   :  { %v285_v41 = vadd.f32 %v284_v33, %v283_v21  ;;  %v291_v42 = vrot.slane %v290_v34, 1  ;;  %v310_v43 = vrot.slane %v309_v35, 2  ;;  %v316_v44 = vadd.f32 %v315_v36, %v314_v30  ;;  %v1762_v36 = vld [vmem:[%s3714_s4 + $0x160] sm:$0xff] }
  0x33   :  { %v298_v45 = vrot.slane %v297_v37, 1  ;;  %v304_v46 = vadd.f32 %v303_v38, %v302_v29  ;;  %v322_v47 = vrot.slane %v321_v39, 4  ;;  %v329_v49 = vrot.slane %v328_v40, 4  ;;  %1919 = vmatpush.msrb.mxu2 %v1762_v36  ;;  %v70_v36 = vld [vmem:[%s3713_s0 + $0x138] sm:$0xff] }
  0x34   :  { %v292_v50 = vadd.f32 %v291_v42, %v290_v34  ;;  %v311_v51 = vadd.f32 %v310_v43, %v309_v35  ;;  %v317_v52 = vrot.slane %v316_v44, 2  ;;  %v1251_v53 = vsel %vm1230_vm2, %v285_v41, %v278_v27  ;;  %v63_v42 = vld [vmem:[%s3713_s0 + $0x100] sm:$0xff] }
  0x35   :  { %v299_v54 = vadd.f32 %v298_v45, %v297_v37  ;;  %v305_v55 = vrot.slane %v304_v46, 1  ;;  %v323_v56 = vadd.f32 %v322_v47, %v321_v39  ;;  %v330_v58 = vadd.f32 %v329_v49, %v328_v40  ;;  %v1730_v37 = vld [vmem:[%s3714_s4 + $0x60] sm:$0xff] }
  0x36   :  { %v312_v59 = vrot.slane %v311_v51, 1  ;;  %v318_v60 = vadd.f32 %v317_v52, %v316_v44  ;;  %v1252_v61 = vsel %vm1232_vm3, %v292_v50, %v1251_v53  ;;  %v335_v62 = vsel %vm159_vm1, %v56_v48, 0.0  ;;  %1789 = vmatpush.msrb.mxu0 %v1730_v37  ;;  %v1778_v43 = vld [vmem:[%s3714_s4 + $0x1e0] sm:$0xff] }
  0x37   :  { %v306_v63 = vadd.f32 %v305_v55, %v304_v46  ;;  %v324_v0 = vrot.slane %v323_v56, 2  ;;  %v1253_v1 = vsel %vm1234_vm4, %v299_v54, %v1252_v61  ;;  %v331_v3 = vrot.slane %v330_v58, 2  ;;  %v1746_v44 = vld [vmem:[%s3714_s4 + $0xe0] sm:$0xff]  ;;  %1984 = vmatpush.msrb.mxu3 %v1778_v43  ;;  %v64_v61 = vld [vmem:[%s3713_s0 + $0x108] sm:$0xff] }
  0x38   :  { %v313_v4 = vadd.f32 %v312_v59, %v311_v51  ;;  %v319_v5 = vrot.slane %v318_v60, 1  ;;  %v336_v6 = vrot.slane %v335_v62, 4  ;;  %v342_v7 = vsel %vm159_vm1, %v57_v57, 0.0  ;;  %1854 = vmatpush.msrb.mxu1 %v1746_v44  ;;  %v71_v44 = vld [vmem:[%s3713_s0 + $0x140] sm:$0xff] }
  0x39   :  { %v325_v8 = vadd.f32 %v324_v0, %v323_v56  ;;  %v1254_v9 = vsel %vm1236_vm5, %v306_v63, %v1253_v1  ;;  %v332_v12 = vadd.f32 %v331_v3, %v330_v58  ;;  %v343_v13 = vrot.slane %v342_v7, 4 }
  0x3a   :  { %v320_v14 = vadd.f32 %v319_v5, %v318_v60  ;;  %v1255_v15 = vsel %vm1238_vm6, %v313_v4, %v1254_v9  ;;  %v337_v16 = vadd.f32 %v336_v6, %v335_v62  ;;  %v349_v17 = vsel %vm159_vm1, %v58_v2, 0.0  ;;  %v65_v6 = vld [vmem:[%s3713_s0 + $0x110] sm:$0xff] }
  0x3b   :  { %v326_v18 = vrot.slane %v325_v8, 1  ;;  %v333_v20 = vrot.slane %v332_v12, 1  ;;  %v344_v21 = vadd.f32 %v343_v13, %v342_v7  ;;  %v350_v22 = vrot.slane %v349_v17, 4 }
  0x3c   :  { %v1256_v23 = vsel %vm1240_vm7, %v320_v14, %v1255_v15  ;;  %v338_v24 = vrot.slane %v337_v16, 2  ;;  %v356_v25 = vsel %vm159_vm1, %v59_v10, 0.0  ;;  %v363_v26 = vsel %vm159_vm1, %v60_v11, 0.0  ;;  %v66_v14 = vld [vmem:[%s3713_s0 + $0x118] sm:$0xff]  ;;  %v67_v15 = vld [vmem:[%s3713_s0 + $0x120] sm:$0xff] }
  0x3d   :  { %v327_v27 = vadd.f32 %v326_v18, %v325_v8  ;;  %v334_v29 = vadd.f32 %v333_v20, %v332_v12  ;;  %v345_v30 = vrot.slane %v344_v21, 2  ;;  %v351_v31 = vadd.f32 %v350_v22, %v349_v17 }
  0x3e   :  { %v339_v32 = vadd.f32 %v338_v24, %v337_v16  ;;  %v357_v33 = vrot.slane %v356_v25, 4  ;;  %v364_v34 = vrot.slane %v363_v26, 4  ;;  %v370_v35 = vsel %vm159_vm1, %v61_v19, 0.0 }
  0x3f   :  { %v1257_v38 = vsel %vm1242_vm8, %v327_v27, %v1256_v23  ;;  %v346_v39 = vadd.f32 %v345_v30, %v344_v21  ;;  %v352_v40 = vrot.slane %v351_v31, 2  ;;  %v371_v41 = vrot.slane %v370_v35, 4 }
  0x40   :  { %2357 = vmatmul.msk.f32.gmra.mxu2 %vm159_vm1, %v1257_v38  ;;  %2374 = vmatmul.msk.f32.gmra.mxu3 %vm159_vm1, %v1257_v38  ;;  %v340_v45 = vrot.slane %v339_v32, 1  ;;  %v358_v46 = vadd.f32 %v357_v33, %v356_v25  ;;  %v365_v47 = vadd.f32 %v364_v34, %v363_v26  ;;  %v377_v48 = vsel %vm159_vm1, %v62_v28, 0.0  ;;  %v68_v26 = vld [vmem:[%s3713_s0 + $0x128] sm:$0xff] }
  0x41   :  { %2323 = vmatmul.msk.f32.gmra.mxu0 %vm159_vm1, %v1257_v38  ;;  %v347_v49 = vrot.slane %v346_v39, 1  ;;  %v353_v50 = vadd.f32 %v352_v40, %v351_v31  ;;  %v372_v51 = vadd.f32 %v371_v41, %v370_v35  ;;  %v378_v52 = vrot.slane %v377_v48, 4  ;;  %2340 = vmatmul.msk.f32.gmra.mxu1 %vm159_vm1, %v1257_v38  ;;  %v69_v35 = vld [vmem:[%s3713_s0 + $0x130] sm:$0xff] }
  0x42   :  { %v341_v53 = vadd.f32 %v340_v45, %v339_v32  ;;  %v359_v54 = vrot.slane %v358_v46, 2  ;;  %v366_v55 = vrot.slane %v365_v47, 2  ;;  %v384_v56 = vsel %vm159_vm1, %v63_v42, 0.0 }
  0x43   :  { %v348_v57 = vadd.f32 %v347_v49, %v346_v39  ;;  %v354_v58 = vrot.slane %v353_v50, 1  ;;  %v373_v59 = vrot.slane %v372_v51, 2  ;;  %v379_v60 = vadd.f32 %v378_v52, %v377_v48  ;;  %v1761_v49 = vld [vmem:[%s3714_s4 + $0x158] sm:$0xff] }
  0x44   :  { %v360_v62 = vadd.f32 %v359_v54, %v358_v46  ;;  %v367_v63 = vadd.f32 %v366_v55, %v365_v47  ;;  %v1258_v0 = vsel %vm1230_vm2, %v341_v53, %v334_v29  ;;  %v385_v1 = vrot.slane %v384_v56, 4  ;;  %1920 = vmatpush.msrb.mxu2 %v1761_v49 }
  0x45   :  { %v355_v2 = vadd.f32 %v354_v58, %v353_v50  ;;  %v374_v3 = vadd.f32 %v373_v59, %v372_v51  ;;  %v380_v4 = vrot.slane %v379_v60, 2  ;;  %v1259_v5 = vsel %vm1232_vm3, %v348_v57, %v1258_v0  ;;  %v1729_v50 = vld [vmem:[%s3714_s4 + $0x58] sm:$0xff] }
  0x46   :  { %v361_v7 = vrot.slane %v360_v62, 1  ;;  %v368_v8 = vrot.slane %v367_v63, 1  ;;  %v386_v9 = vadd.f32 %v385_v1, %v384_v56  ;;  %v391_v10 = vsel %vm159_vm1, %v64_v61, 0.0  ;;  %v1777_v51 = vld [vmem:[%s3714_s4 + $0x1d8] sm:$0xff]  ;;  %1790 = vmatpush.msrb.mxu0 %v1729_v50 }
  0x47   :  { %v375_v11 = vrot.slane %v374_v3, 1  ;;  %v381_v12 = vadd.f32 %v380_v4, %v379_v60  ;;  %v1260_v13 = vsel %vm1234_vm4, %v355_v2, %v1259_v5  ;;  %v392_v16 = vrot.slane %v391_v10, 4  ;;  %v1745_v56 = vld [vmem:[%s3714_s4 + $0xd8] sm:$0xff]  ;;  %1985 = vmatpush.msrb.mxu3 %v1777_v51  ;;  %v72_v5 = vld [vmem:[%s3713_s0 + $0x148] sm:$0xff] }
  0x48   :  { %v362_v17 = vadd.f32 %v361_v7, %v360_v62  ;;  %v369_v18 = vadd.f32 %v368_v8, %v367_v63  ;;  %v387_v19 = vrot.slane %v386_v9, 2  ;;  %v398_v20 = vsel %vm159_vm1, %v65_v6, 0.0  ;;  %1855 = vmatpush.msrb.mxu1 %v1745_v56 }
  0x49   :  { %v376_v21 = vadd.f32 %v375_v11, %v374_v3  ;;  %v382_v22 = vrot.slane %v381_v12, 1  ;;  %v393_v23 = vadd.f32 %v392_v16, %v391_v10  ;;  %v399_v24 = vrot.slane %v398_v20, 4 }
  0x4a   :  { %v1261_v25 = vsel %vm1236_vm5, %v362_v17, %v1260_v13  ;;  %v388_v27 = vadd.f32 %v387_v19, %v386_v9  ;;  %v405_v28 = vsel %vm159_vm1, %v66_v14, 0.0  ;;  %v412_v29 = vsel %vm159_vm1, %v67_v15, 0.0  ;;  %v73_v14 = vld [vmem:[%s3713_s0 + $0x150] sm:$0xff] }
  0x4b   :  { %v383_v30 = vadd.f32 %v382_v22, %v381_v12  ;;  %v1262_v31 = vsel %vm1238_vm6, %v369_v18, %v1261_v25  ;;  %v394_v32 = vrot.slane %v393_v23, 2  ;;  %v400_v33 = vadd.f32 %v399_v24, %v398_v20  ;;  %v74_v24 = vld [vmem:[%s3713_s0 + $0x158] sm:$0xff] }
  0x4c   :  { %v1263_v34 = vsel %vm1240_vm7, %v376_v21, %v1262_v31  ;;  %v389_v37 = vrot.slane %v388_v27, 1  ;;  %v406_v38 = vrot.slane %v405_v28, 4  ;;  %v413_v39 = vrot.slane %v412_v29, 4 }
  0x4d   :  { %v1264_v40 = vsel %vm1242_vm8, %v383_v30, %v1263_v34  ;;  %v395_v41 = vadd.f32 %v394_v32, %v393_v23  ;;  %v401_v42 = vrot.slane %v400_v33, 2  ;;  %v419_v43 = vsel %vm159_vm1, %v68_v26, 0.0  ;;  %v75_v34 = vld [vmem:[%s3713_s0 + $0x160] sm:$0xff] }
  0x4e   :  { %2358 = vmatmul.msk.f32.gmra.mxu2 %vm159_vm1, %v1264_v40  ;;  %2375 = vmatmul.msk.f32.gmra.mxu3 %vm159_vm1, %v1264_v40  ;;  %v390_v45 = vadd.f32 %v389_v37, %v388_v27  ;;  %v407_v46 = vadd.f32 %v406_v38, %v405_v28  ;;  %v414_v47 = vadd.f32 %v413_v39, %v412_v29  ;;  %v420_v48 = vrot.slane %v419_v43, 4 }
  0x4f   :  { %2324 = vmatmul.msk.f32.gmra.mxu0 %vm159_vm1, %v1264_v40  ;;  %v396_v52 = vrot.slane %v395_v41, 1  ;;  %v402_v53 = vadd.f32 %v401_v42, %v400_v33  ;;  %v426_v54 = vsel %vm159_vm1, %v69_v35, 0.0  ;;  %v433_v55 = vsel %vm159_vm1, %v70_v36, 0.0  ;;  %2341 = vmatmul.msk.f32.gmra.mxu1 %vm159_vm1, %v1264_v40  ;;  %v76_v35 = vld [vmem:[%s3713_s0 + $0x168] sm:$0xff] }
  0x50   :  { %v408_v57 = vrot.slane %v407_v46, 2  ;;  %v415_v58 = vrot.slane %v414_v47, 2  ;;  %v421_v59 = vadd.f32 %v420_v48, %v419_v43  ;;  %v427_v60 = vrot.slane %v426_v54, 4  ;;  %v77_v43 = vld [vmem:[%s3713_s0 + $0x170] sm:$0xff]  ;;  %v78_v48 = vld [vmem:[%s3713_s0 + $0x178] sm:$0xff] }
  0x51   :  { %v397_v61 = vadd.f32 %v396_v52, %v395_v41  ;;  %v403_v62 = vrot.slane %v402_v53, 1  ;;  %v434_v63 = vrot.slane %v433_v55, 4  ;;  %v440_v0 = vsel %vm159_vm1, %v71_v44, 0.0 }
  0x52   :  { %v409_v1 = vadd.f32 %v408_v57, %v407_v46  ;;  %v416_v2 = vadd.f32 %v415_v58, %v414_v47  ;;  %v422_v3 = vrot.slane %v421_v59, 2  ;;  %v428_v4 = vadd.f32 %v427_v60, %v426_v54  ;;  %v79_v60 = vld [vmem:[%s3713_s0 + $0x180] sm:$0xff] }
  0x53   :  { %v404_v6 = vadd.f32 %v403_v62, %v402_v53  ;;  %v435_v7 = vadd.f32 %v434_v63, %v433_v55  ;;  %v1265_v8 = vsel %vm1230_vm2, %v397_v61, %v390_v45  ;;  %v441_v9 = vrot.slane %v440_v0, 4 }
  0x54   :  { %v410_v10 = vrot.slane %v409_v1, 1  ;;  %v417_v11 = vrot.slane %v416_v2, 1  ;;  %v423_v12 = vadd.f32 %v422_v3, %v421_v59  ;;  %v429_v13 = vrot.slane %v428_v4, 2 }
  0x55   :  { %v436_v15 = vrot.slane %v435_v7, 2  ;;  %v1266_v16 = vsel %vm1232_vm3, %v404_v6, %v1265_v8  ;;  %v442_v17 = vadd.f32 %v441_v9, %v440_v0  ;;  %v447_v18 = vsel %vm159_vm1, %v72_v5, 0.0  ;;  %v1744_v8 = vld [vmem:[%s3714_s4 + $0xd0] sm:$0xff] }
  0x56   :  { %v411_v19 = vadd.f32 %v410_v10, %v409_v1  ;;  %v418_v20 = vadd.f32 %v417_v11, %v416_v2  ;;  %v424_v21 = vrot.slane %v423_v12, 1  ;;  %v430_v22 = vadd.f32 %v429_v13, %v428_v4  ;;  %v1760_v1 = vld [vmem:[%s3714_s4 + $0x150] sm:$0xff]  ;;  %1856 = vmatpush.msrb.mxu1 %v1744_v8 }
  0x57   :  { %v437_v23 = vadd.f32 %v436_v15, %v435_v7  ;;  %v443_v25 = vrot.slane %v442_v17, 2  ;;  %v448_v26 = vrot.slane %v447_v18, 4  ;;  %v454_v27 = vsel %vm159_vm1, %v73_v14, 0.0  ;;  %v1728_v2 = vld [vmem:[%s3714_s4 + $0x50] sm:$0xff]  ;;  %1921 = vmatpush.msrb.mxu2 %v1760_v1 }
  0x58   :  { %v425_v28 = vadd.f32 %v424_v21, %v423_v12  ;;  %v431_v29 = vrot.slane %v430_v22, 1  ;;  %v1267_v30 = vsel %vm1234_vm4, %v411_v19, %v1266_v16  ;;  %v455_v31 = vrot.slane %v454_v27, 4  ;;  %1791 = vmatpush.msrb.mxu0 %v1728_v2  ;;  %v1776_v7 = vld [vmem:[%s3714_s4 + $0x1d0] sm:$0xff] }
  0x59   :  { %v438_v32 = vrot.slane %v437_v23, 1  ;;  %v1268_v33 = vsel %vm1236_vm5, %v418_v20, %v1267_v30  ;;  %v444_v36 = vadd.f32 %v443_v25, %v442_v17  ;;  %v449_v37 = vadd.f32 %v448_v26, %v447_v18  ;;  %1986 = vmatpush.msrb.mxu3 %v1776_v7  ;;  %v80_v17 = vld [vmem:[%s3713_s0 + $0x188] sm:$0xff]  ;;  %v81_v26 = vld [vmem:[%s3713_s0 + $0x190] sm:$0xff] }
  0x5a   :  { %v432_v38 = vadd.f32 %v431_v29, %v430_v22  ;;  %v1269_v39 = vsel %vm1238_vm6, %v425_v28, %v1268_v33  ;;  %v456_v40 = vadd.f32 %v455_v31, %v454_v27  ;;  %v461_v41 = vsel %vm159_vm1, %v74_v24, 0.0 }
  0x5b   :  { %v439_v42 = vadd.f32 %v438_v32, %v437_v23  ;;  %v445_v44 = vrot.slane %v444_v36, 1  ;;  %v450_v45 = vrot.slane %v449_v37, 2  ;;  %v462_v46 = vrot.slane %v461_v41, 4 }
  0x5c   :  { %v1270_v47 = vsel %vm1240_vm7, %v432_v38, %v1269_v39  ;;  %v457_v49 = vrot.slane %v456_v40, 2  ;;  %v468_v50 = vsel %vm159_vm1, %v75_v34, 0.0  ;;  %v475_v51 = vsel %vm159_vm1, %v76_v35, 0.0  ;;  %v82_v34 = vld [vmem:[%s3713_s0 + $0x198] sm:$0xff] }
  0x5d   :  { %v1271_v52 = vsel %vm1242_vm8, %v439_v42, %v1270_v47  ;;  %v446_v53 = vadd.f32 %v445_v44, %v444_v36  ;;  %v451_v54 = vadd.f32 %v450_v45, %v449_v37  ;;  %v463_v55 = vadd.f32 %v462_v46, %v461_v41 }
  0x5e   :  { %2359 = vmatmul.msk.f32.gmra.mxu2 %vm159_vm1, %v1271_v52  ;;  %2376 = vmatmul.msk.f32.gmra.mxu3 %vm159_vm1, %v1271_v52  ;;  %v458_v56 = vadd.f32 %v457_v49, %v456_v40  ;;  %v469_v57 = vrot.slane %v468_v50, 4  ;;  %v476_v58 = vrot.slane %v475_v51, 4  ;;  %v482_v59 = vsel %vm159_vm1, %v77_v43, 0.0  ;;  %v83_v43 = vld [vmem:[%s3713_s0 + $0x1a0] sm:$0xff] }
  0x5f   :  { %2325 = vmatmul.msk.f32.gmra.mxu0 %vm159_vm1, %v1271_v52  ;;  %v452_v61 = vrot.slane %v451_v54, 1  ;;  %v464_v62 = vrot.slane %v463_v55, 2  ;;  %v483_v63 = vrot.slane %v482_v59, 4  ;;  %v489_v0 = vsel %vm159_vm1, %v78_v48, 0.0  ;;  %2342 = vmatmul.msk.f32.gmra.mxu1 %vm159_vm1, %v1271_v52 }
  0x60   :  { %v459_v3 = vrot.slane %v458_v56, 1  ;;  %v470_v4 = vadd.f32 %v469_v57, %v468_v50  ;;  %v477_v5 = vadd.f32 %v476_v58, %v475_v51  ;;  %v490_v6 = vrot.slane %v489_v0, 4  ;;  %v84_v51 = vld [vmem:[%s3713_s0 + $0x1a8] sm:$0xff] }
  0x61   :  { %v453_v9 = vadd.f32 %v452_v61, %v451_v54  ;;  %v465_v10 = vadd.f32 %v464_v62, %v463_v55  ;;  %v484_v11 = vadd.f32 %v483_v63, %v482_v59  ;;  %v496_v12 = vsel %vm159_vm1, %v79_v60, 0.0  ;;  %v85_v59 = vld [vmem:[%s3713_s0 + $0x1b0] sm:$0xff]  ;;  %v86_v60 = vld [vmem:[%s3713_s0 + $0x1b8] sm:$0xff] }
  0x62   :  { %v460_v13 = vadd.f32 %v459_v3, %v458_v56  ;;  %v471_v14 = vrot.slane %v470_v4, 2  ;;  %v478_v15 = vrot.slane %v477_v5, 2  ;;  %v491_v16 = vadd.f32 %v490_v6, %v489_v0  ;;  %v87_v0 = vld [vmem:[%s3713_s0 + $0x1c0] sm:$0xff] }
  0x63   :  { %v466_v18 = vrot.slane %v465_v10, 1  ;;  %v485_v19 = vrot.slane %v484_v11, 2  ;;  %v1272_v20 = vsel %vm1230_vm2, %v453_v9, %v446_v53  ;;  %v497_v21 = vrot.slane %v496_v12, 4  ;;  %v1759_v9 = vld [vmem:[%s3714_s4 + $0x148] sm:$0xff] }
  0x64   :  { %v472_v22 = vadd.f32 %v471_v14, %v470_v4  ;;  %v479_v23 = vadd.f32 %v478_v15, %v477_v5  ;;  %v492_v24 = vrot.slane %v491_v16, 2  ;;  %v1273_v25 = vsel %vm1232_vm3, %v460_v13, %v1272_v20  ;;  %1922 = vmatpush.msrb.mxu2 %v1759_v9 }
  0x65   :  { %v467_v27 = vadd.f32 %v466_v18, %v465_v10  ;;  %v486_v28 = vadd.f32 %v485_v19, %v484_v11  ;;  %v498_v29 = vadd.f32 %v497_v21, %v496_v12  ;;  %v503_v30 = vsel %vm159_vm1, %v80_v17, 0.0  ;;  %v1727_v10 = vld [vmem:[%s3714_s4 + $0x48] sm:$0xff] }
  0x66   :  { %v473_v31 = vrot.slane %v472_v22, 1  ;;  %v480_v32 = vrot.slane %v479_v23, 1  ;;  %v493_v33 = vadd.f32 %v492_v24, %v491_v16  ;;  %v504_v35 = vrot.slane %v503_v30, 4  ;;  %v1775_v11 = vld [vmem:[%s3714_s4 + $0x1c8] sm:$0xff]  ;;  %1792 = vmatpush.msrb.mxu0 %v1727_v10 }
  0x67   :  { %v487_v36 = vrot.slane %v486_v28, 1  ;;  %v1274_v37 = vsel %vm1234_vm4, %v467_v27, %v1273_v25  ;;  %v499_v38 = vrot.slane %v498_v29, 2  ;;  %v510_v39 = vsel %vm159_vm1, %v81_v26, 0.0  ;;  %v1743_v16 = vld [vmem:[%s3714_s4 + $0xc8] sm:$0xff]  ;;  %1987 = vmatpush.msrb.mxu3 %v1775_v11 }
  0x68   :  { %v474_v40 = vadd.f32 %v473_v31, %v472_v22  ;;  %v481_v41 = vadd.f32 %v480_v32, %v479_v23  ;;  %v494_v42 = vrot.slane %v493_v33, 1  ;;  %v505_v44 = vadd.f32 %v504_v35, %v503_v30  ;;  %v88_v24 = vld [vmem:[%s3713_s0 + $0x1c8] sm:$0xff]  ;;  %1857 = vmatpush.msrb.mxu1 %v1743_v16  ;;  %v95_v16 = vld [vmem:[%s3713_s0 + $0x200] sm:$0xff] }
  0x69   :  { %v488_v45 = vadd.f32 %v487_v36, %v486_v28  ;;  %v500_v46 = vadd.f32 %v499_v38, %v498_v29  ;;  %v511_v47 = vrot.slane %v510_v39, 4  ;;  %v517_v48 = vsel %vm159_vm1, %v82_v34, 0.0 }
  0x6a   :  { %v495_v49 = vadd.f32 %v494_v42, %v493_v33  ;;  %v1275_v50 = vsel %vm1236_vm5, %v474_v40, %v1274_v37  ;;  %v506_v52 = vrot.slane %v505_v44, 2  ;;  %v518_v53 = vrot.slane %v517_v48, 4  ;;  %v89_v37 = vld [vmem:[%s3713_s0 + $0x1d0] sm:$0xff] }
  0x6b   :  { %v1276_v54 = vsel %vm1238_vm6, %v481_v41, %v1275_v50  ;;  %v501_v55 = vrot.slane %v500_v46, 1  ;;  %v512_v56 = vadd.f32 %v511_v47, %v510_v39  ;;  %v524_v57 = vsel %vm159_vm1, %v83_v43, 0.0 }
  0x6c   :  { %v1277_v58 = vsel %vm1240_vm7, %v488_v45, %v1276_v54  ;;  %v507_v61 = vadd.f32 %v506_v52, %v505_v44  ;;  %v519_v62 = vadd.f32 %v518_v53, %v517_v48  ;;  %v525_v63 = vrot.slane %v524_v57, 4  ;;  %v91_v54 = vld [vmem:[%s3713_s0 + $0x1e0] sm:$0xff] }
  0x6d   :  { %v1278_v1 = vsel %vm1242_vm8, %v495_v49, %v1277_v58  ;;  %v502_v2 = vadd.f32 %v501_v55, %v500_v46  ;;  %v513_v3 = vrot.slane %v512_v56, 2  ;;  %v531_v4 = vsel %vm159_vm1, %v84_v51, 0.0  ;;  %v90_v46 = vld [vmem:[%s3713_s0 + $0x1d8] sm:$0xff] }
  0x6e   :  { %2360 = vmatmul.msk.f32.gmra.mxu2 %vm159_vm1, %v1278_v1  ;;  %2377 = vmatmul.msk.f32.gmra.mxu3 %vm159_vm1, %v1278_v1  ;;  %v508_v5 = vrot.slane %v507_v61, 1  ;;  %v520_v6 = vrot.slane %v519_v62, 2  ;;  %v526_v7 = vadd.f32 %v525_v63, %v524_v57  ;;  %v532_v8 = vrot.slane %v531_v4, 4  ;;  %v93_v63 = vld [vmem:[%s3713_s0 + $0x1f0] sm:$0xff] }
  0x6f   :  { %2326 = vmatmul.msk.f32.gmra.mxu0 %vm159_vm1, %v1278_v1  ;;  %v514_v12 = vadd.f32 %v513_v3, %v512_v56  ;;  %v538_v13 = vsel %vm159_vm1, %v85_v59, 0.0  ;;  %v545_v14 = vsel %vm159_vm1, %v86_v60, 0.0  ;;  %2343 = vmatmul.msk.f32.gmra.mxu1 %vm159_vm1, %v1278_v1  ;;  %v552_v15 = vsel %vm159_vm1, %v87_v0, 0.0  ;;  %v94_v0 = vld [vmem:[%s3713_s0 + $0x1f8] sm:$0xff] }
  0x70   :  { %v509_v17 = vadd.f32 %v508_v5, %v507_v61  ;;  %v521_v18 = vadd.f32 %v520_v6, %v519_v62  ;;  %v527_v19 = vrot.slane %v526_v7, 2  ;;  %v533_v20 = vadd.f32 %v532_v8, %v531_v4  ;;  %v92_v62 = vld [vmem:[%s3713_s0 + $0x1e8] sm:$0xff] }
  0x71   :  { %v515_v21 = vrot.slane %v514_v12, 1  ;;  %v539_v22 = vrot.slane %v538_v13, 4  ;;  %v546_v23 = vrot.slane %v545_v14, 4  ;;  %v553_v25 = vrot.slane %v552_v15, 4 }
  0x72   :  { %v522_v26 = vrot.slane %v521_v18, 1  ;;  %v528_v27 = vadd.f32 %v527_v19, %v526_v7  ;;  %v534_v28 = vrot.slane %v533_v20, 2  ;;  %v1279_v29 = vsel %vm1230_vm2, %v509_v17, %v502_v2  ;;  %v1758_v17 = vld [vmem:[%s3714_s4 + $0x140] sm:$0xff] }
  0x73   :  { %v516_v30 = vadd.f32 %v515_v21, %v514_v12  ;;  %v540_v31 = vadd.f32 %v539_v22, %v538_v13  ;;  %v547_v32 = vadd.f32 %v546_v23, %v545_v14  ;;  %v554_v33 = vadd.f32 %v553_v25, %v552_v15  ;;  %1923 = vmatpush.msrb.mxu2 %v1758_v17  ;;  %v1774_v23 = vld [vmem:[%s3714_s4 + $0x1c0] sm:$0xff] }
  0x74   :  { %v523_v34 = vadd.f32 %v522_v26, %v521_v18  ;;  %v529_v35 = vrot.slane %v528_v27, 1  ;;  %v535_v36 = vadd.f32 %v534_v28, %v533_v20  ;;  %v559_v38 = vsel %vm159_vm1, %v88_v24, 0.0  ;;  %v1726_v18 = vld [vmem:[%s3714_s4 + $0x40] sm:$0xff]  ;;  %1988 = vmatpush.msrb.mxu3 %v1774_v23 }
  0x75   :  { %v541_v39 = vrot.slane %v540_v31, 2  ;;  %v548_v40 = vrot.slane %v547_v32, 2  ;;  %v1280_v41 = vsel %vm1232_vm3, %v516_v30, %v1279_v29  ;;  %v555_v42 = vrot.slane %v554_v33, 2  ;;  %1793 = vmatpush.msrb.mxu0 %v1726_v18  ;;  %v1742_v24 = vld [vmem:[%s3714_s4 + $0xc0] sm:$0xff] }
  0x76   :  { %v530_v43 = vadd.f32 %v529_v35, %v528_v27  ;;  %v536_v44 = vrot.slane %v535_v36, 1  ;;  %v1281_v45 = vsel %vm1234_vm4, %v523_v34, %v1280_v41  ;;  %v560_v47 = vrot.slane %v559_v38, 4  ;;  %1858 = vmatpush.msrb.mxu1 %v1742_v24  ;;  %v1757_v24 = vld [vmem:[%s3714_s4 + $0x138] sm:$0xff] }
  0x77   :  { %v542_v48 = vadd.f32 %v541_v39, %v540_v31  ;;  %v549_v49 = vadd.f32 %v548_v40, %v547_v32  ;;  %v556_v50 = vadd.f32 %v555_v42, %v554_v33  ;;  %v566_v51 = vsel %vm159_vm1, %v89_v37, 0.0  ;;  %v96_v37 = vld [vmem:[%s3713_s0 + $0x208] sm:$0xff]  ;;  %1924 = vmatpush.msrb.mxu2 %v1757_v24 }
  0x78   :  { %v537_v52 = vadd.f32 %v536_v44, %v535_v36  ;;  %v1282_v53 = vsel %vm1236_vm5, %v530_v43, %v1281_v45  ;;  %v561_v55 = vadd.f32 %v560_v47, %v559_v38  ;;  %v567_v56 = vrot.slane %v566_v51, 4 }
  0x79   :  { %v543_v57 = vrot.slane %v542_v48, 1  ;;  %v550_v58 = vrot.slane %v549_v49, 1  ;;  %v557_v59 = vrot.slane %v556_v50, 1  ;;  %v573_v60 = vsel %vm159_vm1, %v90_v46, 0.0  ;;  %v97_v46 = vld [vmem:[%s3713_s0 + $0x210] sm:$0xff] }
  0x7a   :  { %v1283_v61 = vsel %vm1238_vm6, %v537_v52, %v1282_v53  ;;  %v562_v1 = vrot.slane %v561_v55, 2  ;;  %v568_v2 = vadd.f32 %v567_v56, %v566_v51  ;;  %v574_v3 = vrot.slane %v573_v60, 4 }
  0x7b   :  { %v544_v4 = vadd.f32 %v543_v57, %v542_v48  ;;  %v551_v5 = vadd.f32 %v550_v58, %v549_v49  ;;  %v558_v6 = vadd.f32 %v557_v59, %v556_v50  ;;  %v580_v7 = vsel %vm159_vm1, %v91_v54, 0.0 }
  0x7c   :  { %v563_v8 = vadd.f32 %v562_v1, %v561_v55  ;;  %v569_v9 = vrot.slane %v568_v2, 2  ;;  %v575_v10 = vadd.f32 %v574_v3, %v573_v60  ;;  %v581_v11 = vrot.slane %v580_v7, 4  ;;  %v98_v55 = vld [vmem:[%s3713_s0 + $0x218] sm:$0xff]  ;;  %v100_v1 = vld [vmem:[%s3713_s0 + $0x228] sm:$0xff] }
  0x7d   :  { %v1284_v12 = vsel %vm1240_vm7, %v544_v4, %v1283_v61  ;;  %v587_v13 = vsel %vm159_vm1, %v92_v62, 0.0  ;;  %v594_v14 = vsel %vm159_vm1, %v93_v63, 0.0  ;;  %v601_v15 = vsel %vm159_vm1, %v94_v0, 0.0  ;;  %v99_v0 = vld [vmem:[%s3713_s0 + $0x220] sm:$0xff] }
  0x7e   :  { %v1285_v19 = vsel %vm1242_vm8, %v551_v5, %v1284_v12  ;;  %v564_v20 = vrot.slane %v563_v8, 1  ;;  %v570_v21 = vadd.f32 %v569_v9, %v568_v2  ;;  %v576_v22 = vrot.slane %v575_v10, 2  ;;  %v101_v2 = vld [vmem:[%s3713_s0 + $0x230] sm:$0xff] }
  0x7f   :  { %2361 = vmatmul.msk.f32.gmra.mxu2 %vm159_vm1, %v1285_v19  ;;  %2378 = vmatmul.msk.f32.gmra.mxu3 %vm159_vm1, %v1285_v19  ;;  %v582_v25 = vadd.f32 %v581_v11, %v580_v7  ;;  %v588_v26 = vrot.slane %v587_v13, 4  ;;  %v595_v27 = vrot.slane %v594_v14, 4  ;;  %v602_v28 = vrot.slane %v601_v15, 4 }
  0x80   :  { %2327 = vmatmul.msk.f32.gmra.mxu0 %vm159_vm1, %v1285_v19  ;;  %v565_v29 = vadd.f32 %v564_v20, %v563_v8  ;;  %v571_v30 = vrot.slane %v570_v21, 1  ;;  %v577_v31 = vadd.f32 %v576_v22, %v575_v10  ;;  %2344 = vmatmul.msk.f32.gmra.mxu1 %vm159_vm1, %v1285_v19  ;;  %v608_v32 = vsel %vm159_vm1, %v95_v16, 0.0  ;;  %v102_v16 = vld [vmem:[%s3713_s0 + $0x238] sm:$0xff] }
  0x81   :  { %v583_v33 = vrot.slane %v582_v25, 2  ;;  %v589_v34 = vadd.f32 %v588_v26, %v587_v13  ;;  %v596_v35 = vadd.f32 %v595_v27, %v594_v14  ;;  %v603_v36 = vadd.f32 %v602_v28, %v601_v15 }
  0x82   :  { %v572_v38 = vadd.f32 %v571_v30, %v570_v21  ;;  %v578_v39 = vrot.slane %v577_v31, 1  ;;  %v1286_v40 = vsel %vm1230_vm2, %v565_v29, %v558_v6  ;;  %v609_v41 = vrot.slane %v608_v32, 4  ;;  %v103_v30 = vld [vmem:[%s3713_s0 + $0x240] sm:$0xff] }
  0x83   :  { %v584_v42 = vadd.f32 %v583_v33, %v582_v25  ;;  %v590_v43 = vrot.slane %v589_v34, 2  ;;  %v597_v44 = vrot.slane %v596_v35, 2  ;;  %v604_v45 = vrot.slane %v603_v36, 2  ;;  %v1725_v25 = vld [vmem:[%s3714_s4 + $0x38] sm:$0xff] }
  0x84   :  { %v579_v47 = vadd.f32 %v578_v39, %v577_v31  ;;  %v1287_v48 = vsel %vm1232_vm3, %v572_v38, %v1286_v40  ;;  %v610_v49 = vadd.f32 %v609_v41, %v608_v32  ;;  %v615_v50 = vsel %vm159_vm1, %v96_v37, 0.0  ;;  %1794 = vmatpush.msrb.mxu0 %v1725_v25  ;;  %v1773_v31 = vld [vmem:[%s3714_s4 + $0x1b8] sm:$0xff] }
  0x85   :  { %v585_v51 = vrot.slane %v584_v42, 1  ;;  %v591_v52 = vadd.f32 %v590_v43, %v589_v34  ;;  %v598_v53 = vadd.f32 %v597_v44, %v596_v35  ;;  %v605_v54 = vadd.f32 %v604_v45, %v603_v36  ;;  %v1741_v32 = vld [vmem:[%s3714_s4 + $0xb8] sm:$0xff]  ;;  %1989 = vmatpush.msrb.mxu3 %v1773_v31 }
  0x86   :  { %v1288_v56 = vsel %vm1234_vm4, %v579_v47, %v1287_v48  ;;  %v611_v57 = vrot.slane %v610_v49, 2  ;;  %v616_v58 = vrot.slane %v615_v50, 4  ;;  %v622_v59 = vsel %vm159_vm1, %v97_v46, 0.0  ;;  %1859 = vmatpush.msrb.mxu1 %v1741_v32 }
  0x87   :  { %v586_v60 = vadd.f32 %v585_v51, %v584_v42  ;;  %v592_v61 = vrot.slane %v591_v52, 1  ;;  %v599_v62 = vrot.slane %v598_v53, 1  ;;  %v606_v63 = vrot.slane %v605_v54, 1 }
  0x88   :  { %v612_v3 = vadd.f32 %v611_v57, %v610_v49  ;;  %v617_v4 = vadd.f32 %v616_v58, %v615_v50  ;;  %v623_v5 = vrot.slane %v622_v59, 4  ;;  %v629_v6 = vsel %vm159_vm1, %v98_v55, 0.0  ;;  %v104_v49 = vld [vmem:[%s3713_s0 + $0x248] sm:$0xff]  ;;  %v105_v58 = vld [vmem:[%s3713_s0 + $0x250] sm:$0xff] }
  0x89   :  { %v593_v7 = vadd.f32 %v592_v61, %v591_v52  ;;  %v600_v8 = vadd.f32 %v599_v62, %v598_v53  ;;  %v607_v9 = vadd.f32 %v606_v63, %v605_v54  ;;  %v1289_v10 = vsel %vm1236_vm5, %v586_v60, %v1288_v56 }
  0x8a   :  { %v613_v11 = vrot.slane %v612_v3, 1  ;;  %v618_v12 = vrot.slane %v617_v4, 2  ;;  %v624_v13 = vadd.f32 %v623_v5, %v622_v59  ;;  %v630_v14 = vrot.slane %v629_v6, 4  ;;  %v107_v5 = vld [vmem:[%s3713_s0 + $0x260] sm:$0xff] }
  0x8b   :  { %v1290_v15 = vsel %vm1238_vm6, %v593_v7, %v1289_v10  ;;  %v636_v17 = vsel %vm159_vm1, %v99_v0, 0.0  ;;  %v643_v18 = vsel %vm159_vm1, %v100_v1, 0.0  ;;  %v650_v19 = vsel %vm159_vm1, %v101_v2, 0.0 }
  0x8c   :  { %v1291_v20 = vsel %vm1240_vm7, %v600_v8, %v1290_v15  ;;  %v614_v21 = vadd.f32 %v613_v11, %v612_v3  ;;  %v619_v22 = vadd.f32 %v618_v12, %v617_v4  ;;  %v625_v23 = vrot.slane %v624_v13, 2  ;;  %v106_v4 = vld [vmem:[%s3713_s0 + $0x258] sm:$0xff] }
  0x8d   :  { %v1292_v26 = vsel %vm1242_vm8, %v607_v9, %v1291_v20  ;;  %v631_v27 = vadd.f32 %v630_v14, %v629_v6  ;;  %v637_v28 = vrot.slane %v636_v17, 4  ;;  %v644_v29 = vrot.slane %v643_v18, 4  ;;  %v108_v14 = vld [vmem:[%s3713_s0 + $0x268] sm:$0xff] }
  0x8e   :  { %2362 = vmatmul.msk.f32.gmra.mxu2 %vm159_vm1, %v1292_v26  ;;  %2379 = vmatmul.msk.f32.gmra.mxu3 %vm159_vm1, %v1292_v26  ;;  %v620_v33 = vrot.slane %v619_v22, 1  ;;  %v626_v34 = vadd.f32 %v625_v23, %v624_v13  ;;  %v651_v35 = vrot.slane %v650_v19, 4  ;;  %v657_v36 = vsel %vm159_vm1, %v102_v16, 0.0  ;;  %v109_v23 = vld [vmem:[%s3713_s0 + $0x270] sm:$0xff] }
  0x8f   :  { %2328 = vmatmul.msk.f32.gmra.mxu0 %vm159_vm1, %v1292_v26  ;;  %v632_v37 = vrot.slane %v631_v27, 2  ;;  %v638_v38 = vadd.f32 %v637_v28, %v636_v17  ;;  %v645_v39 = vadd.f32 %v644_v29, %v643_v18  ;;  %v658_v40 = vrot.slane %v657_v36, 4  ;;  %2345 = vmatmul.msk.f32.gmra.mxu1 %vm159_vm1, %v1292_v26  ;;  %v110_v28 = vld [vmem:[%s3713_s0 + $0x278] sm:$0xff] }
  0x90   :  { %v621_v41 = vadd.f32 %v620_v33, %v619_v22  ;;  %v627_v42 = vrot.slane %v626_v34, 1  ;;  %v652_v43 = vadd.f32 %v651_v35, %v650_v19  ;;  %v664_v44 = vsel %vm159_vm1, %v103_v30, 0.0 }
  0x91   :  { %v633_v45 = vadd.f32 %v632_v37, %v631_v27  ;;  %v639_v46 = vrot.slane %v638_v38, 2  ;;  %v646_v47 = vrot.slane %v645_v39, 2  ;;  %v659_v48 = vadd.f32 %v658_v40, %v657_v36  ;;  %v1756_v36 = vld [vmem:[%s3714_s4 + $0x130] sm:$0xff] }
  0x92   :  { %v628_v50 = vadd.f32 %v627_v42, %v626_v34  ;;  %v653_v51 = vrot.slane %v652_v43, 2  ;;  %v1293_v52 = vsel %vm1230_vm2, %v621_v41, %v614_v21  ;;  %v665_v53 = vrot.slane %v664_v44, 4  ;;  %v1724_v37 = vld [vmem:[%s3714_s4 + $0x30] sm:$0xff]  ;;  %v111_v42 = vld [vmem:[%s3713_s0 + $0x280] sm:$0xff]  ;;  %1925 = vmatpush.msrb.mxu2 %v1756_v36  ;;  %v118_v36 = vld [vmem:[%s3713_s0 + $0x2b8] sm:$0xff] }
  0x93   :  { %v634_v54 = vrot.slane %v633_v45, 1  ;;  %v640_v55 = vadd.f32 %v639_v46, %v638_v38  ;;  %v647_v56 = vadd.f32 %v646_v47, %v645_v39  ;;  %v660_v57 = vrot.slane %v659_v48, 2  ;;  %1795 = vmatpush.msrb.mxu0 %v1724_v37 }
  0x94   :  { %v654_v59 = vadd.f32 %v653_v51, %v652_v43  ;;  %v1294_v60 = vsel %vm1232_vm3, %v628_v50, %v1293_v52  ;;  %v666_v61 = vadd.f32 %v665_v53, %v664_v44  ;;  %v671_v62 = vsel %vm159_vm1, %v104_v49, 0.0  ;;  %v1772_v43 = vld [vmem:[%s3714_s4 + $0x1b0] sm:$0xff] }
  0x95   :  { %v635_v63 = vadd.f32 %v634_v54, %v633_v45  ;;  %v641_v0 = vrot.slane %v640_v55, 1  ;;  %v648_v1 = vrot.slane %v647_v56, 1  ;;  %v661_v2 = vadd.f32 %v660_v57, %v659_v48  ;;  %v1740_v44 = vld [vmem:[%s3714_s4 + $0xb0] sm:$0xff]  ;;  %1990 = vmatpush.msrb.mxu3 %v1772_v43 }
  0x96   :  { %v655_v3 = vrot.slane %v654_v59, 1  ;;  %v667_v6 = vrot.slane %v666_v61, 2  ;;  %v672_v7 = vrot.slane %v671_v62, 4  ;;  %v678_v8 = vsel %vm159_vm1, %v105_v58, 0.0  ;;  %1860 = vmatpush.msrb.mxu1 %v1740_v44 }
  0x97   :  { %v642_v9 = vadd.f32 %v641_v0, %v640_v55  ;;  %v649_v10 = vadd.f32 %v648_v1, %v647_v56  ;;  %v662_v11 = vrot.slane %v661_v2, 1  ;;  %v1295_v12 = vsel %vm1234_vm4, %v635_v63, %v1294_v60 }
  0x98   :  { %v656_v13 = vadd.f32 %v655_v3, %v654_v59  ;;  %v668_v15 = vadd.f32 %v667_v6, %v666_v61  ;;  %v673_v16 = vadd.f32 %v672_v7, %v671_v62  ;;  %v679_v17 = vrot.slane %v678_v8, 4  ;;  %v112_v61 = vld [vmem:[%s3713_s0 + $0x288] sm:$0xff]  ;;  %v113_v6 = vld [vmem:[%s3713_s0 + $0x290] sm:$0xff] }
  0x99   :  { %v663_v18 = vadd.f32 %v662_v11, %v661_v2  ;;  %v1296_v19 = vsel %vm1236_vm5, %v642_v9, %v1295_v12  ;;  %v685_v20 = vsel %vm159_vm1, %v106_v4, 0.0  ;;  %v692_v21 = vsel %vm159_vm1, %v107_v5, 0.0 }
  0x9a   :  { %v1297_v22 = vsel %vm1238_vm6, %v649_v10, %v1296_v19  ;;  %v669_v24 = vrot.slane %v668_v15, 1  ;;  %v674_v25 = vrot.slane %v673_v16, 2  ;;  %v680_v26 = vadd.f32 %v679_v17, %v678_v8 }
  0x9b   :  { %v1298_v27 = vsel %vm1240_vm7, %v656_v13, %v1297_v22  ;;  %v686_v29 = vrot.slane %v685_v20, 4  ;;  %v693_v30 = vrot.slane %v692_v21, 4  ;;  %v699_v31 = vsel %vm159_vm1, %v108_v14, 0.0 }
  0x9c   :  { %v1299_v32 = vsel %vm1242_vm8, %v663_v18, %v1298_v27  ;;  %v670_v33 = vadd.f32 %v669_v24, %v668_v15  ;;  %v675_v34 = vadd.f32 %v674_v25, %v673_v16  ;;  %v681_v35 = vrot.slane %v680_v26, 2  ;;  %v114_v16 = vld [vmem:[%s3713_s0 + $0x298] sm:$0xff]  ;;  %v116_v27 = vld [vmem:[%s3713_s0 + $0x2a8] sm:$0xff] }
  0x9d   :  { %2363 = vmatmul.msk.f32.gmra.mxu2 %vm159_vm1, %v1299_v32  ;;  %2380 = vmatmul.msk.f32.gmra.mxu3 %vm159_vm1, %v1299_v32  ;;  %v687_v38 = vadd.f32 %v686_v29, %v685_v20  ;;  %v694_v39 = vadd.f32 %v693_v30, %v692_v21  ;;  %v700_v40 = vrot.slane %v699_v31, 4  ;;  %v706_v41 = vsel %vm159_vm1, %v109_v23, 0.0 }
  0x9e   :  { %2329 = vmatmul.msk.f32.gmra.mxu0 %vm159_vm1, %v1299_v32  ;;  %v676_v45 = vrot.slane %v675_v34, 1  ;;  %v682_v46 = vadd.f32 %v681_v35, %v680_v26  ;;  %v707_v47 = vrot.slane %v706_v41, 4  ;;  %v713_v48 = vsel %vm159_vm1, %v110_v28, 0.0  ;;  %2346 = vmatmul.msk.f32.gmra.mxu1 %vm159_vm1, %v1299_v32  ;;  %v115_v26 = vld [vmem:[%s3713_s0 + $0x2a0] sm:$0xff]  ;;  %v117_v35 = vld [vmem:[%s3713_s0 + $0x2b0] sm:$0xff] }
  0x9f   :  { %v688_v49 = vrot.slane %v687_v38, 2  ;;  %v695_v50 = vrot.slane %v694_v39, 2  ;;  %v701_v51 = vadd.f32 %v700_v40, %v699_v31  ;;  %v714_v52 = vrot.slane %v713_v48, 4 }
  0xa0   :  { %v677_v53 = vadd.f32 %v676_v45, %v675_v34  ;;  %v683_v54 = vrot.slane %v682_v46, 1  ;;  %v708_v55 = vadd.f32 %v707_v47, %v706_v41  ;;  %v720_v56 = vsel %vm159_vm1, %v111_v42, 0.0 }
  0xa1   :  { %v689_v57 = vadd.f32 %v688_v49, %v687_v38  ;;  %v696_v58 = vadd.f32 %v695_v50, %v694_v39  ;;  %v702_v59 = vrot.slane %v701_v51, 2  ;;  %v715_v60 = vadd.f32 %v714_v52, %v713_v48  ;;  %v119_v48 = vld [vmem:[%s3713_s0 + $0x2c0] sm:$0xff] }
  0xa2   :  { %v684_v62 = vadd.f32 %v683_v54, %v682_v46  ;;  %v709_v63 = vrot.slane %v708_v55, 2  ;;  %v1300_v0 = vsel %vm1230_vm2, %v677_v53, %v670_v33  ;;  %v721_v1 = vrot.slane %v720_v56, 4  ;;  %v1755_v53 = vld [vmem:[%s3714_s4 + $0x128] sm:$0xff] }
  0xa3   :  { %v690_v2 = vrot.slane %v689_v57, 1  ;;  %v697_v3 = vrot.slane %v696_v58, 1  ;;  %v703_v4 = vadd.f32 %v702_v59, %v701_v51  ;;  %v716_v5 = vrot.slane %v715_v60, 2  ;;  %v1723_v54 = vld [vmem:[%s3714_s4 + $0x28] sm:$0xff]  ;;  %1926 = vmatpush.msrb.mxu2 %v1755_v53 }
  0xa4   :  { %v710_v7 = vadd.f32 %v709_v63, %v708_v55  ;;  %v1301_v8 = vsel %vm1232_vm3, %v684_v62, %v1300_v0  ;;  %v722_v9 = vadd.f32 %v721_v1, %v720_v56  ;;  %v727_v10 = vsel %vm159_vm1, %v112_v61, 0.0  ;;  %v1771_v55 = vld [vmem:[%s3714_s4 + $0x1a8] sm:$0xff]  ;;  %1796 = vmatpush.msrb.mxu0 %v1723_v54 }
  0xa5   :  { %v691_v11 = vadd.f32 %v690_v2, %v689_v57  ;;  %v698_v12 = vadd.f32 %v697_v3, %v696_v58  ;;  %v704_v13 = vrot.slane %v703_v4, 1  ;;  %v717_v14 = vadd.f32 %v716_v5, %v715_v60  ;;  %v1739_v60 = vld [vmem:[%s3714_s4 + $0xa8] sm:$0xff]  ;;  %1991 = vmatpush.msrb.mxu3 %v1771_v55 }
  0xa6   :  { %v711_v15 = vrot.slane %v710_v7, 1  ;;  %v723_v17 = vrot.slane %v722_v9, 2  ;;  %v728_v18 = vrot.slane %v727_v10, 4  ;;  %v734_v19 = vsel %vm159_vm1, %v113_v6, 0.0  ;;  %1861 = vmatpush.msrb.mxu1 %v1739_v60 }
  0xa7   :  { %v705_v20 = vadd.f32 %v704_v13, %v703_v4  ;;  %v718_v21 = vrot.slane %v717_v14, 1  ;;  %v1302_v22 = vsel %vm1234_vm4, %v691_v11, %v1301_v8  ;;  %v735_v23 = vrot.slane %v734_v19, 4  ;;  %v120_v8 = vld [vmem:[%s3713_s0 + $0x2c8] sm:$0xff] }
  0xa8   :  { %v712_v24 = vadd.f32 %v711_v15, %v710_v7  ;;  %v1303_v25 = vsel %vm1236_vm5, %v698_v12, %v1302_v22  ;;  %v724_v28 = vadd.f32 %v723_v17, %v722_v9  ;;  %v729_v29 = vadd.f32 %v728_v18, %v727_v10  ;;  %v121_v17 = vld [vmem:[%s3713_s0 + $0x2d0] sm:$0xff] }
  0xa9   :  { %v719_v30 = vadd.f32 %v718_v21, %v717_v14  ;;  %v1304_v31 = vsel %vm1238_vm6, %v705_v20, %v1303_v25  ;;  %v736_v32 = vadd.f32 %v735_v23, %v734_v19  ;;  %v741_v33 = vsel %vm159_vm1, %v114_v16, 0.0  ;;  %v122_v25 = vld [vmem:[%s3713_s0 + $0x2d8] sm:$0xff] }
  0xaa   :  { %v1305_v34 = vsel %vm1240_vm7, %v712_v24, %v1304_v31  ;;  %v725_v37 = vrot.slane %v724_v28, 1  ;;  %v730_v38 = vrot.slane %v729_v29, 2  ;;  %v742_v39 = vrot.slane %v741_v33, 4 }
  0xab   :  { %v1306_v40 = vsel %vm1242_vm8, %v719_v30, %v1305_v34  ;;  %v737_v41 = vrot.slane %v736_v32, 2  ;;  %v748_v42 = vsel %vm159_vm1, %v115_v26, 0.0  ;;  %v755_v43 = vsel %vm159_vm1, %v116_v27, 0.0  ;;  %v123_v34 = vld [vmem:[%s3713_s0 + $0x2e0] sm:$0xff] }
  0xac   :  { %2364 = vmatmul.msk.f32.gmra.mxu2 %vm159_vm1, %v1306_v40  ;;  %2381 = vmatmul.msk.f32.gmra.mxu3 %vm159_vm1, %v1306_v40  ;;  %v726_v44 = vadd.f32 %v725_v37, %v724_v28  ;;  %v731_v45 = vadd.f32 %v730_v38, %v729_v29  ;;  %v743_v46 = vadd.f32 %v742_v39, %v741_v33  ;;  %v749_v47 = vrot.slane %v748_v42, 4 }
  0xad   :  { %2330 = vmatmul.msk.f32.gmra.mxu0 %vm159_vm1, %v1306_v40  ;;  %v738_v49 = vadd.f32 %v737_v41, %v736_v32  ;;  %v756_v50 = vrot.slane %v755_v43, 4  ;;  %v762_v51 = vsel %vm159_vm1, %v117_v35, 0.0  ;;  %v769_v52 = vsel %vm159_vm1, %v118_v36, 0.0  ;;  %2347 = vmatmul.msk.f32.gmra.mxu1 %vm159_vm1, %v1306_v40 }
  0xae   :  { %v732_v56 = vrot.slane %v731_v45, 1  ;;  %v744_v57 = vrot.slane %v743_v46, 2  ;;  %v750_v58 = vadd.f32 %v749_v47, %v748_v42  ;;  %v763_v59 = vrot.slane %v762_v51, 4 }
  0xaf   :  { %v739_v61 = vrot.slane %v738_v49, 1  ;;  %v757_v62 = vadd.f32 %v756_v50, %v755_v43  ;;  %v770_v63 = vrot.slane %v769_v52, 4  ;;  %v776_v0 = vsel %vm159_vm1, %v119_v48, 0.0  ;;  %v124_v43 = vld [vmem:[%s3713_s0 + $0x2e8] sm:$0xff] }
  0xb0   :  { %v733_v1 = vadd.f32 %v732_v56, %v731_v45  ;;  %v745_v2 = vadd.f32 %v744_v57, %v743_v46  ;;  %v751_v3 = vrot.slane %v750_v58, 2  ;;  %v764_v4 = vadd.f32 %v763_v59, %v762_v51  ;;  %v127_v56 = vld [vmem:[%s3713_s0 + $0x300] sm:$0xff] }
  0xb1   :  { %v740_v5 = vadd.f32 %v739_v61, %v738_v49  ;;  %v758_v6 = vrot.slane %v757_v62, 2  ;;  %v771_v7 = vadd.f32 %v770_v63, %v769_v52  ;;  %v777_v9 = vrot.slane %v776_v0, 4  ;;  %v126_v52 = vld [vmem:[%s3713_s0 + $0x2f8] sm:$0xff] }
  0xb2   :  { %v746_v10 = vrot.slane %v745_v2, 1  ;;  %v752_v11 = vadd.f32 %v751_v3, %v750_v58  ;;  %v765_v12 = vrot.slane %v764_v4, 2  ;;  %v1307_v13 = vsel %vm1230_vm2, %v733_v1, %v726_v44  ;;  %v125_v44 = vld [vmem:[%s3713_s0 + $0x2f0] sm:$0xff]  ;;  %v1754_v1 = vld [vmem:[%s3714_s4 + $0x120] sm:$0xff] }
  0xb3   :  { %v759_v14 = vadd.f32 %v758_v6, %v757_v62  ;;  %v772_v15 = vrot.slane %v771_v7, 2  ;;  %v1308_v16 = vsel %vm1232_vm3, %v740_v5, %v1307_v13  ;;  %v778_v18 = vadd.f32 %v777_v9, %v776_v0  ;;  %v1770_v3 = vld [vmem:[%s3714_s4 + $0x1a0] sm:$0xff]  ;;  %1927 = vmatpush.msrb.mxu2 %v1754_v1 }
  0xb4   :  { %v747_v19 = vadd.f32 %v746_v10, %v745_v2  ;;  %v753_v20 = vrot.slane %v752_v11, 1  ;;  %v766_v21 = vadd.f32 %v765_v12, %v764_v4  ;;  %v783_v22 = vsel %vm159_vm1, %v120_v8, 0.0  ;;  %v1722_v2 = vld [vmem:[%s3714_s4 + $0x20] sm:$0xff]  ;;  %1992 = vmatpush.msrb.mxu3 %v1770_v3 }
  0xb5   :  { %v760_v23 = vrot.slane %v759_v14, 1  ;;  %v773_v24 = vadd.f32 %v772_v15, %v771_v7  ;;  %v779_v26 = vrot.slane %v778_v18, 2  ;;  %v784_v27 = vrot.slane %v783_v22, 4  ;;  %1797 = vmatpush.msrb.mxu0 %v1722_v2  ;;  %v1738_v8 = vld [vmem:[%s3714_s4 + $0xa0] sm:$0xff] }
  0xb6   :  { %v754_v28 = vadd.f32 %v753_v20, %v752_v11  ;;  %v767_v29 = vrot.slane %v766_v21, 1  ;;  %v1309_v30 = vsel %vm1234_vm4, %v747_v19, %v1308_v16  ;;  %v790_v31 = vsel %vm159_vm1, %v121_v17, 0.0  ;;  %1862 = vmatpush.msrb.mxu1 %v1738_v8  ;;  %v128_v16 = vld [vmem:[%s3713_s0 + $0x308] sm:$0xff] }
  0xb7   :  { %v761_v32 = vadd.f32 %v760_v23, %v759_v14  ;;  %v774_v33 = vrot.slane %v773_v24, 1  ;;  %v780_v35 = vadd.f32 %v779_v26, %v778_v18  ;;  %v785_v36 = vadd.f32 %v784_v27, %v783_v22 }
  0xb8   :  { %v768_v37 = vadd.f32 %v767_v29, %v766_v21  ;;  %v1310_v38 = vsel %vm1236_vm5, %v754_v28, %v1309_v30  ;;  %v791_v39 = vrot.slane %v790_v31, 4  ;;  %v797_v40 = vsel %vm159_vm1, %v122_v25, 0.0  ;;  %v129_v29 = vld [vmem:[%s3713_s0 + $0x310] sm:$0xff] }
  0xb9   :  { %v775_v41 = vadd.f32 %v774_v33, %v773_v24  ;;  %v1311_v42 = vsel %vm1238_vm6, %v761_v32, %v1310_v38  ;;  %v781_v45 = vrot.slane %v780_v35, 1  ;;  %v786_v46 = vrot.slane %v785_v36, 2  ;;  %v130_v38 = vld [vmem:[%s3713_s0 + $0x318] sm:$0xff] }
  0xba   :  { %v1312_v47 = vsel %vm1240_vm7, %v768_v37, %v1311_v42  ;;  %v792_v48 = vadd.f32 %v791_v39, %v790_v31  ;;  %v798_v49 = vrot.slane %v797_v40, 4  ;;  %v804_v50 = vsel %vm159_vm1, %v123_v34, 0.0  ;;  %v131_v42 = vld [vmem:[%s3713_s0 + $0x320] sm:$0xff] }
  0xbb   :  { %v1313_v51 = vsel %vm1242_vm8, %v775_v41, %v1312_v47  ;;  %v782_v53 = vadd.f32 %v781_v45, %v780_v35  ;;  %v787_v54 = vadd.f32 %v786_v46, %v785_v36  ;;  %v805_v55 = vrot.slane %v804_v50, 4 }
  0xbc   :  { %2365 = vmatmul.msk.f32.gmra.mxu2 %vm159_vm1, %v1313_v51  ;;  %2382 = vmatmul.msk.f32.gmra.mxu3 %vm159_vm1, %v1313_v51  ;;  %v793_v57 = vrot.slane %v792_v48, 2  ;;  %v799_v58 = vadd.f32 %v798_v49, %v797_v40  ;;  %v811_v59 = vsel %vm159_vm1, %v124_v43, 0.0  ;;  %v818_v60 = vsel %vm159_vm1, %v125_v44, 0.0 }
  0xbd   :  { %2331 = vmatmul.msk.f32.gmra.mxu0 %vm159_vm1, %v1313_v51  ;;  %v788_v61 = vrot.slane %v787_v54, 1  ;;  %v806_v62 = vadd.f32 %v805_v55, %v804_v50  ;;  %v812_v63 = vrot.slane %v811_v59, 4  ;;  %v819_v0 = vrot.slane %v818_v60, 4  ;;  %2348 = vmatmul.msk.f32.gmra.mxu1 %vm159_vm1, %v1313_v51  ;;  %v132_v50 = vld [vmem:[%s3713_s0 + $0x328] sm:$0xff]  ;;  %v133_v55 = vld [vmem:[%s3713_s0 + $0x330] sm:$0xff] }
  0xbe   :  { %v794_v4 = vadd.f32 %v793_v57, %v792_v48  ;;  %v800_v5 = vrot.slane %v799_v58, 2  ;;  %v825_v6 = vsel %vm159_vm1, %v126_v52, 0.0  ;;  %v832_v7 = vsel %vm159_vm1, %v127_v56, 0.0 }
  0xbf   :  { %v789_v9 = vadd.f32 %v788_v61, %v787_v54  ;;  %v807_v10 = vrot.slane %v806_v62, 2  ;;  %v813_v11 = vadd.f32 %v812_v63, %v811_v59  ;;  %v820_v12 = vadd.f32 %v819_v0, %v818_v60  ;;  %v134_v63 = vld [vmem:[%s3713_s0 + $0x338] sm:$0xff] }
  0xc0   :  { %v795_v13 = vrot.slane %v794_v4, 1  ;;  %v801_v14 = vadd.f32 %v800_v5, %v799_v58  ;;  %v826_v15 = vrot.slane %v825_v6, 4  ;;  %v833_v17 = vrot.slane %v832_v7, 4 }
  0xc1   :  { %v808_v18 = vadd.f32 %v807_v10, %v806_v62  ;;  %v814_v19 = vrot.slane %v813_v11, 2  ;;  %v821_v20 = vrot.slane %v820_v12, 2  ;;  %v1314_v21 = vsel %vm1230_vm2, %v789_v9, %v782_v53  ;;  %v1753_v9 = vld [vmem:[%s3714_s4 + $0x118] sm:$0xff] }
  0xc2   :  { %v796_v22 = vadd.f32 %v795_v13, %v794_v4  ;;  %v802_v23 = vrot.slane %v801_v14, 1  ;;  %v827_v24 = vadd.f32 %v826_v15, %v825_v6  ;;  %v834_v25 = vadd.f32 %v833_v17, %v832_v7  ;;  %v135_v4 = vld [vmem:[%s3713_s0 + $0x340] sm:$0xff]  ;;  %v1721_v10 = vld [vmem:[%s3714_s4 + $0x18] sm:$0xff]  ;;  %1928 = vmatpush.msrb.mxu2 %v1753_v9 }
  0xc3   :  { %v809_v26 = vrot.slane %v808_v18, 1  ;;  %v815_v27 = vadd.f32 %v814_v19, %v813_v11  ;;  %v822_v28 = vadd.f32 %v821_v20, %v820_v12  ;;  %v839_v30 = vsel %vm159_vm1, %v128_v16, 0.0  ;;  %v1769_v15 = vld [vmem:[%s3714_s4 + $0x198] sm:$0xff]  ;;  %1798 = vmatpush.msrb.mxu0 %v1721_v10 }
  0xc4   :  { %v803_v31 = vadd.f32 %v802_v23, %v801_v14  ;;  %v828_v32 = vrot.slane %v827_v24, 2  ;;  %v1315_v33 = vsel %vm1232_vm3, %v796_v22, %v1314_v21  ;;  %v835_v34 = vrot.slane %v834_v25, 2  ;;  %v1737_v16 = vld [vmem:[%s3714_s4 + $0x98] sm:$0xff]  ;;  %1993 = vmatpush.msrb.mxu3 %v1769_v15 }
  0xc5   :  { %v810_v35 = vadd.f32 %v809_v26, %v808_v18  ;;  %v816_v36 = vrot.slane %v815_v27, 1  ;;  %v823_v37 = vrot.slane %v822_v28, 1  ;;  %v840_v39 = vrot.slane %v839_v30, 4  ;;  %1863 = vmatpush.msrb.mxu1 %v1737_v16  ;;  %v143_v16 = vld [vmem:[%s3713_s0 + $0x380] sm:$0xff] }
  0xc6   :  { %v829_v40 = vadd.f32 %v828_v32, %v827_v24  ;;  %v1316_v41 = vsel %vm1234_vm4, %v803_v31, %v1315_v33  ;;  %v836_v43 = vadd.f32 %v835_v34, %v834_v25  ;;  %v846_v44 = vsel %vm159_vm1, %v129_v29, 0.0 }
  0xc7   :  { %v817_v45 = vadd.f32 %v816_v36, %v815_v27  ;;  %v824_v46 = vadd.f32 %v823_v37, %v822_v28  ;;  %v1317_v47 = vsel %vm1236_vm5, %v810_v35, %v1316_v41  ;;  %v841_v48 = vadd.f32 %v840_v39, %v839_v30  ;;  %v136_v28 = vld [vmem:[%s3713_s0 + $0x348] sm:$0xff]  ;;  %v137_v41 = vld [vmem:[%s3713_s0 + $0x350] sm:$0xff] }
  0xc8   :  { %v830_v49 = vrot.slane %v829_v40, 1  ;;  %v837_v51 = vrot.slane %v836_v43, 1  ;;  %v847_v52 = vrot.slane %v846_v44, 4  ;;  %v853_v53 = vsel %vm159_vm1, %v130_v38, 0.0 }
  0xc9   :  { %v1318_v54 = vsel %vm1238_vm6, %v817_v45, %v1317_v47  ;;  %v842_v56 = vrot.slane %v841_v48, 2  ;;  %v854_v57 = vrot.slane %v853_v53, 4  ;;  %v860_v58 = vsel %vm159_vm1, %v131_v42, 0.0 }
  0xca   :  { %v831_v59 = vadd.f32 %v830_v49, %v829_v40  ;;  %v1319_v60 = vsel %vm1240_vm7, %v824_v46, %v1318_v54  ;;  %v838_v61 = vadd.f32 %v837_v51, %v836_v43  ;;  %v848_v62 = vadd.f32 %v847_v52, %v846_v44 }
  0xcb   :  { %v843_v0 = vadd.f32 %v842_v56, %v841_v48  ;;  %v855_v1 = vadd.f32 %v854_v57, %v853_v53  ;;  %v861_v2 = vrot.slane %v860_v58, 4  ;;  %v867_v3 = vsel %vm159_vm1, %v132_v50, 0.0  ;;  %v138_v50 = vld [vmem:[%s3713_s0 + $0x358] sm:$0xff] }
  0xcc   :  { %v1320_v5 = vsel %vm1242_vm8, %v831_v59, %v1319_v60  ;;  %v849_v6 = vrot.slane %v848_v62, 2  ;;  %v868_v7 = vrot.slane %v867_v3, 4  ;;  %v874_v8 = vsel %vm159_vm1, %v133_v55, 0.0  ;;  %v140_v59 = vld [vmem:[%s3713_s0 + $0x368] sm:$0xff] }
  0xcd   :  { %2366 = vmatmul.msk.f32.gmra.mxu2 %vm159_vm1, %v1320_v5  ;;  %2383 = vmatmul.msk.f32.gmra.mxu3 %vm159_vm1, %v1320_v5  ;;  %v844_v11 = vrot.slane %v843_v0, 1  ;;  %v856_v12 = vrot.slane %v855_v1, 2  ;;  %v862_v13 = vadd.f32 %v861_v2, %v860_v58  ;;  %v875_v14 = vrot.slane %v874_v8, 4  ;;  %v139_v58 = vld [vmem:[%s3713_s0 + $0x360] sm:$0xff] }
  0xce   :  { %2332 = vmatmul.msk.f32.gmra.mxu0 %vm159_vm1, %v1320_v5  ;;  %v850_v17 = vadd.f32 %v849_v6, %v848_v62  ;;  %v869_v18 = vadd.f32 %v868_v7, %v867_v3  ;;  %v881_v19 = vsel %vm159_vm1, %v134_v63, 0.0  ;;  %2349 = vmatmul.msk.f32.gmra.mxu1 %vm159_vm1, %v1320_v5  ;;  %v888_v20 = vsel %vm159_vm1, %v135_v4, 0.0  ;;  %v141_v3 = vld [vmem:[%s3713_s0 + $0x370] sm:$0xff]  ;;  %v142_v4 = vld [vmem:[%s3713_s0 + $0x378] sm:$0xff] }
  0xcf   :  { %v845_v21 = vadd.f32 %v844_v11, %v843_v0  ;;  %v857_v22 = vadd.f32 %v856_v12, %v855_v1  ;;  %v863_v23 = vrot.slane %v862_v13, 2  ;;  %v876_v24 = vadd.f32 %v875_v14, %v874_v8 }
  0xd0   :  { %v851_v25 = vrot.slane %v850_v17, 1  ;;  %v870_v26 = vrot.slane %v869_v18, 2  ;;  %v882_v27 = vrot.slane %v881_v19, 4  ;;  %v889_v29 = vrot.slane %v888_v20, 4 }
  0xd1   :  { %v858_v30 = vrot.slane %v857_v22, 1  ;;  %v864_v31 = vadd.f32 %v863_v23, %v862_v13  ;;  %v877_v32 = vrot.slane %v876_v24, 2  ;;  %v1321_v33 = vsel %vm1230_vm2, %v845_v21, %v838_v61  ;;  %v1768_v23 = vld [vmem:[%s3714_s4 + $0x190] sm:$0xff] }
  0xd2   :  { %v852_v34 = vadd.f32 %v851_v25, %v850_v17  ;;  %v871_v35 = vadd.f32 %v870_v26, %v869_v18  ;;  %v883_v36 = vadd.f32 %v882_v27, %v881_v19  ;;  %v890_v37 = vadd.f32 %v889_v29, %v888_v20  ;;  %v1752_v17 = vld [vmem:[%s3714_s4 + $0x110] sm:$0xff]  ;;  %1994 = vmatpush.msrb.mxu3 %v1768_v23 }
  0xd3   :  { %v859_v38 = vadd.f32 %v858_v30, %v857_v22  ;;  %v865_v39 = vrot.slane %v864_v31, 1  ;;  %v878_v40 = vadd.f32 %v877_v32, %v876_v24  ;;  %v895_v42 = vsel %vm159_vm1, %v136_v28, 0.0  ;;  %v1720_v18 = vld [vmem:[%s3714_s4 + $0x10] sm:$0xff]  ;;  %1929 = vmatpush.msrb.mxu2 %v1752_v17 }
  0xd4   :  { %v872_v43 = vrot.slane %v871_v35, 1  ;;  %v884_v44 = vrot.slane %v883_v36, 2  ;;  %v1322_v45 = vsel %vm1232_vm3, %v852_v34, %v1321_v33  ;;  %v891_v46 = vrot.slane %v890_v37, 2  ;;  %1799 = vmatpush.msrb.mxu0 %v1720_v18  ;;  %v1736_v24 = vld [vmem:[%s3714_s4 + $0x90] sm:$0xff] }
  0xd5   :  { %v866_v47 = vadd.f32 %v865_v39, %v864_v31  ;;  %v879_v48 = vrot.slane %v878_v40, 1  ;;  %v1323_v49 = vsel %vm1234_vm4, %v859_v38, %v1322_v45  ;;  %v896_v51 = vrot.slane %v895_v42, 4  ;;  %1864 = vmatpush.msrb.mxu1 %v1736_v24 }
  0xd6   :  { %v873_v52 = vadd.f32 %v872_v43, %v871_v35  ;;  %v885_v53 = vadd.f32 %v884_v44, %v883_v36  ;;  %v892_v54 = vadd.f32 %v891_v46, %v890_v37  ;;  %v902_v55 = vsel %vm159_vm1, %v137_v41, 0.0 }
  0xd7   :  { %v880_v56 = vadd.f32 %v879_v48, %v878_v40  ;;  %v1324_v57 = vsel %vm1236_vm5, %v866_v47, %v1323_v49  ;;  %v897_v60 = vadd.f32 %v896_v51, %v895_v42  ;;  %v903_v61 = vrot.slane %v902_v55, 4  ;;  %v144_v40 = vld [vmem:[%s3713_s0 + $0x388] sm:$0xff]  ;;  %v145_v49 = vld [vmem:[%s3713_s0 + $0x390] sm:$0xff] }
  0xd8   :  { %v886_v62 = vrot.slane %v885_v53, 1  ;;  %v1325_v63 = vsel %vm1238_vm6, %v873_v52, %v1324_v57  ;;  %v893_v0 = vrot.slane %v892_v54, 1  ;;  %v909_v1 = vsel %vm159_vm1, %v138_v50, 0.0 }
  0xd9   :  { %v1326_v2 = vsel %vm1240_vm7, %v880_v56, %v1325_v63  ;;  %v898_v5 = vrot.slane %v897_v60, 2  ;;  %v904_v6 = vadd.f32 %v903_v61, %v902_v55  ;;  %v910_v7 = vrot.slane %v909_v1, 4 }
  0xda   :  { %v887_v8 = vadd.f32 %v886_v62, %v885_v53  ;;  %v894_v9 = vadd.f32 %v893_v0, %v892_v54  ;;  %v916_v10 = vsel %vm159_vm1, %v139_v58, 0.0  ;;  %v923_v11 = vsel %vm159_vm1, %v140_v59, 0.0  ;;  %v146_v58 = vld [vmem:[%s3713_s0 + $0x398] sm:$0xff] }
  0xdb   :  { %v899_v12 = vadd.f32 %v898_v5, %v897_v60  ;;  %v905_v13 = vrot.slane %v904_v6, 2  ;;  %v911_v14 = vadd.f32 %v910_v7, %v909_v1  ;;  %v917_v15 = vrot.slane %v916_v10, 4 }
  0xdc   :  { %v1327_v19 = vsel %vm1242_vm8, %v887_v8, %v1326_v2  ;;  %v924_v20 = vrot.slane %v923_v11, 4  ;;  %v930_v21 = vsel %vm159_vm1, %v141_v3, 0.0  ;;  %v937_v22 = vsel %vm159_vm1, %v142_v4, 0.0  ;;  %v147_v3 = vld [vmem:[%s3713_s0 + $0x3a0] sm:$0xff] }
  0xdd   :  { %2367 = vmatmul.msk.f32.gmra.mxu2 %vm159_vm1, %v1327_v19  ;;  %2384 = vmatmul.msk.f32.gmra.mxu3 %vm159_vm1, %v1327_v19  ;;  %v900_v25 = vrot.slane %v899_v12, 1  ;;  %v906_v26 = vadd.f32 %v905_v13, %v904_v6  ;;  %v912_v27 = vrot.slane %v911_v14, 2  ;;  %v918_v28 = vadd.f32 %v917_v15, %v916_v10  ;;  %v148_v6 = vld [vmem:[%s3713_s0 + $0x3a8] sm:$0xff]  ;;  %v150_v15 = vld [vmem:[%s3713_s0 + $0x3b8] sm:$0xff] }
  0xde   :  { %2333 = vmatmul.msk.f32.gmra.mxu0 %vm159_vm1, %v1327_v19  ;;  %v925_v29 = vadd.f32 %v924_v20, %v923_v11  ;;  %v931_v30 = vrot.slane %v930_v21, 4  ;;  %v938_v31 = vrot.slane %v937_v22, 4  ;;  %2350 = vmatmul.msk.f32.gmra.mxu1 %vm159_vm1, %v1327_v19  ;;  %v944_v32 = vsel %vm159_vm1, %v143_v16, 0.0 }
  0xdf   :  { %v901_v33 = vadd.f32 %v900_v25, %v899_v12  ;;  %v907_v34 = vrot.slane %v906_v26, 1  ;;  %v913_v35 = vadd.f32 %v912_v27, %v911_v14  ;;  %v919_v36 = vrot.slane %v918_v28, 2  ;;  %v149_v14 = vld [vmem:[%s3713_s0 + $0x3b0] sm:$0xff] }
  0xe0   :  { %v926_v37 = vrot.slane %v925_v29, 2  ;;  %v932_v38 = vadd.f32 %v931_v30, %v930_v21  ;;  %v939_v39 = vadd.f32 %v938_v31, %v937_v22  ;;  %v945_v41 = vrot.slane %v944_v32, 4 }
  0xe1   :  { %v908_v42 = vadd.f32 %v907_v34, %v906_v26  ;;  %v914_v43 = vrot.slane %v913_v35, 1  ;;  %v920_v44 = vadd.f32 %v919_v36, %v918_v28  ;;  %v1328_v45 = vsel %vm1230_vm2, %v901_v33, %v894_v9  ;;  %v151_v28 = vld [vmem:[%s3713_s0 + $0x3c0] sm:$0xff]  ;;  %v1751_v33 = vld [vmem:[%s3714_s4 + $0x108] sm:$0xff] }
  0xe2   :  { %v927_v46 = vadd.f32 %v926_v37, %v925_v29  ;;  %v933_v47 = vrot.slane %v932_v38, 2  ;;  %v940_v48 = vrot.slane %v939_v39, 2  ;;  %v946_v50 = vadd.f32 %v945_v41, %v944_v32  ;;  %v1719_v34 = vld [vmem:[%s3714_s4 + $0x8] sm:$0xff]  ;;  %v1750_v41 = vld [vmem:[%s3714_s4 + $0x100] sm:$0xff]  ;;  %1930 = vmatpush.msrb.mxu2 %v1751_v33  ;;  %v157_v33 = vld [vmem:[%s3713_s0 + $0x3f0] sm:$0xff] }
  0xe3   :  { %v915_v51 = vadd.f32 %v914_v43, %v913_v35  ;;  %v921_v52 = vrot.slane %v920_v44, 1  ;;  %v1329_v53 = vsel %vm1232_vm3, %v908_v42, %v1328_v45  ;;  %v951_v54 = vsel %vm159_vm1, %v144_v40, 0.0  ;;  %v1767_v35 = vld [vmem:[%s3714_s4 + $0x188] sm:$0xff]  ;;  %v1718_v42 = vld [vmem:[%s3714_s4] sm:$0xff]  ;;  %v3374_v43 = vpop.f32.mrf.mxu0  ;;  %1800 = vmatpush.msrb.mxu0 %v1719_v34 }
  0xe4   :  { %v928_v55 = vrot.slane %v927_v46, 1  ;;  %v934_v56 = vadd.f32 %v933_v47, %v932_v38  ;;  %v941_v57 = vadd.f32 %v940_v48, %v939_v39  ;;  %v947_v59 = vrot.slane %v946_v50, 2  ;;  %v1735_v40 = vld [vmem:[%s3714_s4 + $0x88] sm:$0xff]  ;;  %v1766_v48 = vld [vmem:[%s3714_s4 + $0x180] sm:$0xff]  ;;  %1995 = vmatpush.msrb.mxu3 %v1767_v35  ;;  %1931 = vmatpush.msrb.mxu2 %v1750_v41 }
  0xe5   :  { %v922_v60 = vadd.f32 %v921_v52, %v920_v44  ;;  %v1330_v61 = vsel %vm1234_vm4, %v915_v51, %v1329_v53  ;;  %v952_v62 = vrot.slane %v951_v54, 4  ;;  %v958_v63 = vsel %vm159_vm1, %v145_v49, 0.0  ;;  %v3380_v49 = vpop.f32.mrf.mxu1  ;;  %1865 = vmatpush.msrb.mxu1 %v1735_v40  ;;  %1801 = vmatpush.msrb.mxu0 %v1718_v42 }
  0xe6   :  { %v929_v0 = vadd.f32 %v928_v55, %v927_v46  ;;  %v935_v1 = vrot.slane %v934_v56, 1  ;;  %v942_v2 = vrot.slane %v941_v57, 1  ;;  %v948_v4 = vadd.f32 %v947_v59, %v946_v50  ;;  %v1734_v55 = vld [vmem:[%s3714_s4 + $0x80] sm:$0xff]  ;;  %1996 = vmatpush.msrb.mxu3 %v1766_v48 }
  0xe7   :  { %v1331_v5 = vsel %vm1236_vm5, %v922_v60, %v1330_v61  ;;  %v953_v7 = vadd.f32 %v952_v62, %v951_v54  ;;  %v959_v8 = vrot.slane %v958_v63, 4  ;;  %v965_v9 = vsel %vm159_vm1, %v146_v58, 0.0  ;;  %v3382_v54 = vpop.f32.mrf.mxu2  ;;  %v152_v60 = vld [vmem:[%s3713_s0 + $0x3c8] sm:$0xff]  ;;  %1866 = vmatpush.msrb.mxu1 %v1734_v55 }
  0xe8   :  { %v936_v10 = vadd.f32 %v935_v1, %v934_v56  ;;  %v943_v11 = vadd.f32 %v942_v2, %v941_v57  ;;  %v1332_v12 = vsel %vm1238_vm6, %v929_v0, %v1331_v5  ;;  %v949_v13 = vrot.slane %v948_v4, 1  ;;  %v3387_v56 = vpop.f32.mrf.mxu3  ;;  %v153_v5 = vld [vmem:[%s3713_s0 + $0x3d0] sm:$0xff] }
  0xe9   :  { %v954_v16 = vrot.slane %v953_v7, 2  ;;  %v960_v17 = vadd.f32 %v959_v8, %v958_v63  ;;  %v966_v18 = vrot.slane %v965_v9, 4  ;;  %v972_v19 = vsel %vm159_vm1, %v147_v3, 0.0 }
  0xea   :  { %v1333_v20 = vsel %vm1240_vm7, %v936_v10, %v1332_v12  ;;  %v950_v21 = vadd.f32 %v949_v13, %v948_v4  ;;  %v973_v22 = vrot.slane %v972_v19, 4  ;;  %v979_v23 = vsel %vm159_vm1, %v148_v6, 0.0 }
  0xeb   :  { %v1334_v24 = vsel %vm1242_vm8, %v943_v11, %v1333_v20  ;;  %v955_v25 = vadd.f32 %v954_v16, %v953_v7  ;;  %v961_v26 = vrot.slane %v960_v17, 2  ;;  %v967_v27 = vadd.f32 %v966_v18, %v965_v9 }
  0xec   :  { %2368 = vmatmul.msk.f32.gmra.mxu2 %vm159_vm1, %v1334_v24  ;;  %2385 = vmatmul.msk.f32.gmra.mxu3 %vm159_vm1, %v1334_v24  ;;  %v974_v29 = vadd.f32 %v973_v22, %v972_v19  ;;  %v980_v30 = vrot.slane %v979_v23, 4  ;;  %v986_v31 = vsel %vm159_vm1, %v149_v14, 0.0  ;;  %v993_v32 = vsel %vm159_vm1, %v150_v15, 0.0  ;;  %v154_v14 = vld [vmem:[%s3713_s0 + $0x3d8] sm:$0xff] }
  0xed   :  { %2334 = vmatmul.msk.f32.gmra.mxu0 %vm159_vm1, %v1334_v24  ;;  %v956_v36 = vrot.slane %v955_v25, 1  ;;  %v962_v37 = vadd.f32 %v961_v26, %v960_v17  ;;  %v968_v38 = vrot.slane %v967_v27, 2  ;;  %v987_v39 = vrot.slane %v986_v31, 4  ;;  %2351 = vmatmul.msk.f32.gmra.mxu1 %vm159_vm1, %v1334_v24 }
  0xee   :  { %v975_v44 = vrot.slane %v974_v29, 2  ;;  %v981_v45 = vadd.f32 %v980_v30, %v979_v23  ;;  %v994_v46 = vrot.slane %v993_v32, 4  ;;  %v1000_v47 = vsel %vm159_vm1, %v151_v28, 0.0  ;;  %v155_v23 = vld [vmem:[%s3713_s0 + $0x3e0] sm:$0xff] }
  0xef   :  { %v957_v50 = vadd.f32 %v956_v36, %v955_v25  ;;  %v963_v51 = vrot.slane %v962_v37, 1  ;;  %v969_v52 = vadd.f32 %v968_v38, %v967_v27  ;;  %v988_v53 = vadd.f32 %v987_v39, %v986_v31  ;;  %v3417_v36 = vpop.f32.mrf.mxu1  ;;  %v3421_v41 = vpop.f32.mrf.mxu2 }
  0xf0   :  { %v976_v57 = vadd.f32 %v975_v44, %v974_v29  ;;  %v982_v58 = vrot.slane %v981_v45, 2  ;;  %v995_v59 = vadd.f32 %v994_v46, %v993_v32  ;;  %v1001_v61 = vrot.slane %v1000_v47, 4  ;;  %v3408_v29 = vpop.f32.mrf.mxu0  ;;  %v156_v32 = vld [vmem:[%s3713_s0 + $0x3e8] sm:$0xff]  ;;  %v3423_v42 = vpop.f32.mrf.mxu3 }
  0xf1   :  { %v964_v62 = vadd.f32 %v963_v51, %v962_v37  ;;  %v970_v63 = vrot.slane %v969_v52, 1  ;;  %v989_v0 = vrot.slane %v988_v53, 2  ;;  %v1335_v1 = vsel %vm1230_vm2, %v957_v50, %v950_v21 }
  0xf2   :  { %v977_v2 = vrot.slane %v976_v57, 1  ;;  %v983_v3 = vadd.f32 %v982_v58, %v981_v45  ;;  %v996_v4 = vrot.slane %v995_v59, 2  ;;  %v1002_v6 = vadd.f32 %v1001_v61, %v1000_v47  ;;  %v158_v45 = vld [vmem:[%s3713_s0 + $0x3f8] sm:$0xff] }
  0xf3   :  { %v971_v7 = vadd.f32 %v970_v63, %v969_v52  ;;  %v990_v8 = vadd.f32 %v989_v0, %v988_v53  ;;  %v1336_v9 = vsel %vm1232_vm3, %v964_v62, %v1335_v1  ;;  %v1007_v10 = vsel %vm159_vm1, %v152_v60, 0.0 }
  0xf4   :  { %v978_v11 = vadd.f32 %v977_v2, %v976_v57  ;;  %v984_v12 = vrot.slane %v983_v3, 1  ;;  %v997_v13 = vadd.f32 %v996_v4, %v995_v59  ;;  %v1003_v15 = vrot.slane %v1002_v6, 2 }
  0xf5   :  { %v991_v16 = vrot.slane %v990_v8, 1  ;;  %v1337_v17 = vsel %vm1234_vm4, %v971_v7, %v1336_v9  ;;  %v1008_v18 = vrot.slane %v1007_v10, 4  ;;  %v1014_v19 = vsel %vm159_vm1, %v153_v5, 0.0 }
  0xf6   :  { %v985_v20 = vadd.f32 %v984_v12, %v983_v3  ;;  %v998_v21 = vrot.slane %v997_v13, 1  ;;  %v1338_v22 = vsel %vm1236_vm5, %v978_v11, %v1337_v17  ;;  %v1004_v24 = vadd.f32 %v1003_v15, %v1002_v6 }
  0xf7   :  { %v992_v25 = vadd.f32 %v991_v16, %v990_v8  ;;  %v1009_v26 = vadd.f32 %v1008_v18, %v1007_v10  ;;  %v1015_v27 = vrot.slane %v1014_v19, 4  ;;  %v1021_v28 = vsel %vm159_vm1, %v154_v14, 0.0  ;;  %v3439_v18 = vpop.f32.mrf.mxu1 }
  0xf8   :  { %v999_v30 = vadd.f32 %v998_v21, %v997_v13  ;;  %v1339_v31 = vsel %vm1238_vm6, %v985_v20, %v1338_v22  ;;  %v1005_v34 = vrot.slane %v1004_v24, 1  ;;  %v1022_v35 = vrot.slane %v1021_v28, 4  ;;  %v3437_v13 = vpop.f32.mrf.mxu0  ;;  %v1547_v21 = vpop.f32.mrf.mxu2 }
  0xf9   :  { %v1340_v37 = vsel %vm1240_vm7, %v992_v25, %v1339_v31  ;;  %v1010_v38 = vrot.slane %v1009_v26, 2  ;;  %v1016_v39 = vadd.f32 %v1015_v27, %v1014_v19  ;;  %v1028_v40 = vsel %vm159_vm1, %v155_v23, 0.0  ;;  %v1612_v22 = vpop.f32.mrf.mxu3 }
  0xfa   :  { %v1341_v44 = vsel %vm1242_vm8, %v999_v30, %v1340_v37  ;;  %v1023_v46 = vadd.f32 %v1022_v35, %v1021_v28  ;;  %v1029_v47 = vrot.slane %v1028_v40, 4  ;;  %v1035_v51 = vsel %vm159_vm1, %v156_v32, 0.0  ;;  %v1092_v28 = vld [vmem:[%s3715_s3] sm:$0xf] }
  0xfb   :  { %2369 = vmatmul.msk.f32.gmra.mxu2 %vm159_vm1, %v1341_v44  ;;  %2386 = vmatmul.msk.f32.gmra.mxu3 %vm159_vm1, %v1341_v44  ;;  %v1011_v48 = vadd.f32 %v1010_v38, %v1009_v26  ;;  %v1017_v50 = vrot.slane %v1016_v39, 2  ;;  %v1042_v52 = vsel %vm159_vm1, %v157_v33, 0.0  ;;  %v1036_v57 = vrot.slane %v1035_v51, 4 }
  0xfc   :  { %2335 = vmatmul.msk.f32.gmra.mxu0 %vm159_vm1, %v1341_v44  ;;  %v1024_v53 = vrot.slane %v1023_v46, 2  ;;  %v1030_v55 = vadd.f32 %v1029_v47, %v1028_v40  ;;  %v1043_v58 = vrot.slane %v1042_v52, 4  ;;  %2352 = vmatmul.msk.f32.gmra.mxu1 %vm159_vm1, %v1341_v44  ;;  %v1006_v59 = vadd.f32 %v1005_v34, %v1004_v24 }
  0xfd   :  { %v1012_v60 = vrot.slane %v1011_v48, 1  ;;  %v1018_v61 = vadd.f32 %v1017_v50, %v1016_v39  ;;  %v1049_v62 = vsel %vm159_vm1, %v158_v45, 0.0  ;;  %v1037_v1 = vadd.f32 %v1036_v57, %v1035_v51 }
  0xfe   :  { %v1025_v63 = vadd.f32 %v1024_v53, %v1023_v46  ;;  %v1031_v0 = vrot.slane %v1030_v55, 2  ;;  %v1044_v2 = vadd.f32 %v1043_v58, %v1042_v52  ;;  %v1050_v5 = vrot.slane %v1049_v62, 4 }
  0xff   :  { %v1013_v3 = vadd.f32 %v1012_v60, %v1011_v48  ;;  %v1019_v4 = vrot.slane %v1018_v61, 1  ;;  %v1038_v8 = vrot.slane %v1037_v1, 2  ;;  %v3448_v35 = vperm.slane %v1092_v28, 2  ;;  %v1485_v50 = vpop.f32.mrf.mxu1 }
 0x100   :  { %v1026_v6 = vrot.slane %v1025_v63, 1  ;;  %v1032_v7 = vadd.f32 %v1031_v0, %v1030_v55  ;;  %v1045_v9 = vrot.slane %v1044_v2, 2  ;;  %v1051_v11 = vadd.f32 %v1050_v5, %v1049_v62  ;;  %v1420_v46 = vpop.f32.mrf.mxu0  ;;  %v1550_v53 = vpop.f32.mrf.mxu2 }
 0x101   :  { %v1020_v10 = vadd.f32 %v1019_v4, %v1018_v61  ;;  %v1342_v12 = vsel %vm1230_vm2, %v1013_v3, %v1006_v59  ;;  %v1039_v16 = vadd.f32 %v1038_v8, %v1037_v1  ;;  %v3450_v37 = vperm.slane %v1092_v28, 3  ;;  %v1615_v55 = vpop.f32.mrf.mxu3 }
 0x102   :  { %v1027_v14 = vadd.f32 %v1026_v6, %v1025_v63  ;;  %v1033_v15 = vrot.slane %v1032_v7, 1  ;;  %v1046_v17 = vadd.f32 %v1045_v9, %v1044_v2  ;;  %v1052_v19 = vrot.slane %v1051_v11, 2 }
 0x103   :  { %v1343_v20 = vsel %vm1232_vm3, %v1020_v10, %v1342_v12  ;;  %v1040_v24 = vrot.slane %v1039_v16, 1  ;;  %v3453_v40 = vperm.slane %v1092_v28, 0  ;;  %v3455_v44 = vperm.slane %v1092_v28, 1 }
 0x104   :  { %v1034_v23 = vadd.f32 %v1033_v15, %v1032_v7  ;;  %v1047_v25 = vrot.slane %v1046_v17, 1  ;;  %v1344_v26 = vsel %vm1234_vm4, %v1027_v14, %v1343_v20  ;;  %v1053_v27 = vadd.f32 %v1052_v19, %v1051_v11 }
 0x105   :  { %v1041_v30 = vadd.f32 %v1040_v24, %v1039_v16  ;;  %v1542_v47 = vadd.f32 %v3382_v54, %v3448_v35  ;;  %v1607_v48 = vadd.f32 %v3387_v56, %v3450_v37  ;;  %v1412_v51 = vadd.f32 %v3374_v43, %v3453_v40 }
 0x106   :  { %v1048_v31 = vadd.f32 %v1047_v25, %v1046_v17  ;;  %v1345_v32 = vsel %vm1236_vm5, %v1034_v23, %v1344_v26  ;;  %v1054_v33 = vrot.slane %v1053_v27, 1  ;;  %v1477_v52 = vadd.f32 %v3380_v49, %v3455_v44 }
 0x107   :  { %v1346_v34 = vsel %vm1238_vm6, %v1041_v30, %v1345_v32  ;;  %v1656_v57 = vmax.f32 %v1542_v47, 0.0  ;;  %v1657_v58 = vmax.f32 %v1607_v48, 0.0  ;;  %v1654_v59 = vmax.f32 %v1412_v51, 0.0  ;;  %v1488_v62 = vpop.f32.mrf.mxu1 }
 0x108   :  { %v1055_v38 = vadd.f32 %v1054_v33, %v1053_v27  ;;  %v1347_v39 = vsel %vm1240_vm7, %v1048_v31, %v1346_v34  ;;  %v1655_v54 = vmax.f32 %v1477_v52, 0.0  ;;  %v1545_v56 = vadd.f32 %v3421_v41, %v3448_v35  ;;  %v1423_v61 = vpop.f32.mrf.mxu0  ;;  %v1553_v63 = vpop.f32.mrf.mxu2 }
 0x109   :  { %v1610_v60 = vadd.f32 %v3423_v42, %v3450_v37  ;;  %v1415_v43 = vadd.f32 %v3408_v29, %v3453_v40  ;;  %v1480_v49 = vadd.f32 %v3417_v36, %v3455_v44  ;;  %v1618_v0 = vpop.f32.mrf.mxu3  ;;  %v1548_v41 = vadd.f32 %v1547_v21, %v3448_v35 }
 0x10a   :  { %v1348_v45 = vsel %vm1242_vm8, %v1055_v38, %v1347_v39  ;;  %v1660_v1 = vmax.f32 %v1545_v56, 0.0  ;;  %v1613_v42 = vadd.f32 %v1612_v22, %v3450_v37  ;;  %v1418_v29 = vadd.f32 %v3437_v13, %v3453_v40 }
 0x10b   :  { %2370 = vmatmul.msk.f32.gmra.mxu2 %vm159_vm1, %v1348_v45  ;;  %2387 = vmatmul.msk.f32.gmra.mxu3 %vm159_vm1, %v1348_v45  ;;  %v1661_v2 = vmax.f32 %v1610_v60, 0.0  ;;  %v1658_v3 = vmax.f32 %v1415_v43, 0.0  ;;  %v1659_v4 = vmax.f32 %v1480_v49, 0.0  ;;  %v1483_v36 = vadd.f32 %v3439_v18, %v3455_v44 }
 0x10c   :  { %2336 = vmatmul.msk.f32.gmra.mxu0 %vm159_vm1, %v1348_v45  ;;  %2353 = vmatmul.msk.f32.gmra.mxu1 %vm159_vm1, %v1348_v45  ;;  %v1664_v6 = vmax.f32 %v1548_v41, 0.0  ;;  %v1665_v7 = vmax.f32 %v1613_v42, 0.0  ;;  %v1662_v9 = vmax.f32 %v1418_v29, 0.0  ;;  %v1551_v14 = vadd.f32 %v1550_v53, %v3448_v35 }
 0x10d   :  { %v1663_v10 = vmax.f32 %v1483_v36, 0.0  ;;  %v1616_v15 = vadd.f32 %v1615_v55, %v3450_v37  ;;  %v1421_v13 = vadd.f32 %v1420_v46, %v3453_v40  ;;  %v1486_v16 = vadd.f32 %v1485_v50, %v3455_v44 }
 0x10e   :  { %v1668_v17 = vmax.f32 %v1551_v14, 0.0  ;;  %v1554_v25 = vadd.f32 %v1553_v63, %v3448_v35  ;;  %v1619_v26 = vadd.f32 %v1618_v0, %v3450_v37  ;;  %v1424_v27 = vadd.f32 %v1423_v61, %v3453_v40 }
 0x10f   :  { %v1491_v8 = vpop.f32.mrf.mxu1  ;;  %v1669_v18 = vmax.f32 %v1616_v15, 0.0  ;;  %v1666_v19 = vmax.f32 %v1421_v13, 0.0  ;;  %v1667_v20 = vmax.f32 %v1486_v16, 0.0  ;;  %v1489_v28 = vadd.f32 %v1488_v62, %v3455_v44 }
 0x110   :  { %v1426_v5 = vpop.f32.mrf.mxu0  ;;  %v1556_v11 = vpop.f32.mrf.mxu2  ;;  %v1672_v30 = vmax.f32 %v1554_v25, 0.0  ;;  %v1673_v31 = vmax.f32 %v1619_v26, 0.0  ;;  %v1670_v32 = vmax.f32 %v1424_v27, 0.0  ;;  %v1492_v47 = vadd.f32 %v1491_v8, %v3455_v44 }
 0x111   :  { %v1621_v12 = vpop.f32.mrf.mxu3  ;;  %v1671_v33 = vmax.f32 %v1489_v28, 0.0  ;;  %v1557_v38 = vadd.f32 %v1556_v11, %v3448_v35  ;;  %v1427_v46 = vadd.f32 %v1426_v5, %v3453_v40  ;;  %v2131_v11 = vld [vmem:[%s3718_s1] sm:$0xff]  ;;  %vm2280_vm1 = vcmask 523712  }
 0x112   :  { %v1622_v39 = vadd.f32 %v1621_v12, %v3450_v37  ;;  %v1675_v55 = vmax.f32 %v1492_v47, 0.0  ;;  %v2148_v15 = vsel %vm2147_vm9, %v2131_v11, 0.0  ;;  %vm2284_vm2 = vcmask 589312  }
 0x113   :  { %1932 = vmatmul.f32.vlgmr.msrb.gmra.mxu2 %v1656_v57  ;;  %1997 = vmatmul.f32.vlgmr.msrb.gmra.mxu3 %v1657_v58  ;;  %v1676_v51 = vmax.f32 %v1557_v38, 0.0  ;;  %v1674_v53 = vmax.f32 %v1427_v46, 0.0  ;;  %vm2288_vm3 = vcmask 654912   ;;  %vm2292_vm4 = vcmask 720512  }
 0x114   :  { %1802 = vmatmul.f32.vlgmr.msrb.gmra.mxu0 %v1654_v59  ;;  %1867 = vmatmul.f32.vlgmr.msrb.gmra.mxu1 %v1655_v54  ;;  %v1677_v52 = vmax.f32 %v1622_v39, 0.0  ;;  %vm2296_vm5 = vcmask 786112   ;;  %vm2300_vm6 = vcmask 851712   ;;  %vm2304_vm7 = vcmask 917312  }
 0x115   :  { %2149 = vadd.xlane.f32.xlu1 %v2148_v15  ;;  %vm2308_vm8 = vcmask 982912  }
 0x117   :  { %v1494_v22 = vpop.f32.mrf.mxu1 }
 0x118   :  { %v1429_v21 = vpop.f32.mrf.mxu0  ;;  %v1559_v23 = vpop.f32.mrf.mxu2  ;;  %v1495_v54 = vadd.f32 %v1494_v22, %v3455_v44 }
 0x119   :  { %v1624_v24 = vpop.f32.mrf.mxu3  ;;  %v1560_v57 = vadd.f32 %v1559_v23, %v3448_v35  ;;  %v1430_v59 = vadd.f32 %v1429_v21, %v3453_v40 }
 0x11a   :  { %v1625_v58 = vadd.f32 %v1624_v24, %v3450_v37  ;;  %v1679_v0 = vmax.f32 %v1495_v54, 0.0 }
 0x11b   :  { %1935 = vmatmul.f32.gmra.mxu2 %v1660_v1  ;;  %2000 = vmatmul.f32.gmra.mxu3 %v1661_v2  ;;  %v1680_v61 = vmax.f32 %v1560_v57, 0.0  ;;  %v1678_v63 = vmax.f32 %v1430_v59, 0.0 }
 0x11c   :  { %1805 = vmatmul.f32.gmra.mxu0 %v1658_v3  ;;  %1870 = vmatmul.f32.gmra.mxu1 %v1659_v4  ;;  %v1681_v62 = vmax.f32 %v1625_v58, 0.0 }
 0x11f   :  { %v1497_v45 = vpop.f32.mrf.mxu1 }
 0x120   :  { %v1432_v34 = vpop.f32.mrf.mxu0  ;;  %v1562_v48 = vpop.f32.mrf.mxu2  ;;  %v1498_v4 = vadd.f32 %v1497_v45, %v3455_v44 }
 0x121   :  { %v1627_v50 = vpop.f32.mrf.mxu3  ;;  %v1563_v1 = vadd.f32 %v1562_v48, %v3448_v35  ;;  %v1433_v3 = vadd.f32 %v1432_v34, %v3453_v40 }
 0x122   :  { %v1628_v2 = vadd.f32 %v1627_v50, %v3450_v37 }
 0x123   :  { %1938 = vmatmul.f32.gmra.mxu2 %v1664_v6  ;;  %2003 = vmatmul.f32.gmra.mxu3 %v1665_v7  ;;  %v1684_v42 = vmax.f32 %v1563_v1, 0.0  ;;  %v1682_v5 = vmax.f32 %v1433_v3, 0.0  ;;  %v1683_v6 = vmax.f32 %v1498_v4, 0.0 }
 0x124   :  { %1808 = vmatmul.f32.gmra.mxu0 %v1662_v9  ;;  %1873 = vmatmul.f32.gmra.mxu1 %v1663_v10  ;;  %v1685_v29 = vmax.f32 %v1628_v2, 0.0 }
 0x127   :  { %v1500_v60 = vpop.f32.mrf.mxu1 }
 0x128   :  { %v1435_v56 = vpop.f32.mrf.mxu0  ;;  %v1565_v43 = vpop.f32.mrf.mxu2  ;;  %v1501_v14 = vadd.f32 %v1500_v60, %v3455_v44  ;;  %v13_v60 = vstv %s3719_s7 }
 0x129   :  { %v1630_v49 = vpop.f32.mrf.mxu3  ;;  %v1566_v9 = vadd.f32 %v1565_v43, %v3448_v35  ;;  %v1436_v12 = vadd.f32 %v1435_v56, %v3453_v40  ;;  %14 = vst [vmem:[#allocation2] sm:$0x1] %v13_v60 }
 0x12a   :  { %v1631_v10 = vadd.f32 %v1630_v49, %v3450_v37  ;;  %v2393_v49 = vmov 0  }
 0x12b   :  { %1941 = vmatmul.f32.gmra.mxu2 %v1668_v17  ;;  %2006 = vmatmul.f32.gmra.mxu3 %v1669_v18  ;;  %v1688_v13 = vmax.f32 %v1566_v9, 0.0  ;;  %v1686_v17 = vmax.f32 %v1436_v12, 0.0  ;;  %v1687_v18 = vmax.f32 %v1501_v14, 0.0 }
 0x12c   :  { %1811 = vmatmul.f32.gmra.mxu0 %v1666_v19  ;;  %1876 = vmatmul.f32.gmra.mxu1 %v1667_v20  ;;  %v1689_v16 = vmax.f32 %v1631_v10, 0.0 }
 0x12d   :  { %2389 = vset.pattern.permute.xlu1 %v2393_v49  ;;  %2390 = vset.pattern.permute.xlu0 %v2393_v49  ;;  %v3572_v49 = vld [vmem:[%s3716_s5] ss:$0 sm:$0xff] }
 0x12f   :  { %v1503_v36 = vpop.f32.mrf.mxu1 }
 0x130   :  { %v1438_v41 = vpop.f32.mrf.mxu0  ;;  %v1568_v7 = vpop.f32.mrf.mxu2  ;;  %v1504_v26 = vadd.f32 %v1503_v36, %v3455_v44 }
 0x131   :  { %v1633_v8 = vpop.f32.mrf.mxu3  ;;  %v1569_v23 = vadd.f32 %v1568_v7, %v3448_v35  ;;  %v1439_v25 = vadd.f32 %v1438_v41, %v3453_v40 }
 0x132   :  { %v1634_v24 = vadd.f32 %v1633_v8, %v3450_v37 }
 0x133   :  { %1944 = vmatmul.f32.gmra.mxu2 %v1672_v30  ;;  %2009 = vmatmul.f32.gmra.mxu3 %v1673_v31  ;;  %v1692_v27 = vmax.f32 %v1569_v23, 0.0  ;;  %v1690_v30 = vmax.f32 %v1439_v25, 0.0  ;;  %v1691_v31 = vmax.f32 %v1504_v26, 0.0 }
 0x134   :  { %1814 = vmatmul.f32.gmra.mxu0 %v1670_v32  ;;  %1879 = vmatmul.f32.gmra.mxu1 %v1671_v33  ;;  %v1693_v28 = vmax.f32 %v1634_v24, 0.0 }
 0x13a   :  { %v1441_v19 = vpop.f32.mrf.mxu0  ;;  %v1506_v20 = vpop.f32.mrf.mxu1 }
 0x13b   :  { %1947 = vmatmul.f32.gmra.mxu2 %v1676_v51  ;;  %2012 = vmatmul.f32.gmra.mxu3 %v1677_v52  ;;  %v1442_v39 = vadd.f32 %v1441_v19, %v3453_v40  ;;  %v1507_v45 = vadd.f32 %v1506_v20, %v3455_v44 }
 0x13c   :  { %1817 = vmatmul.f32.gmra.mxu0 %v1674_v53  ;;  %1882 = vmatmul.f32.gmra.mxu1 %v1675_v55  ;;  %v2133_v53 = vld [vmem:[%s3718_s1 + $0x10] sm:$0xff] }
 0x13d   :  { %v1694_v51 = vmax.f32 %v1442_v39, 0.0  ;;  %v1695_v52 = vmax.f32 %v1507_v45, 0.0  ;;  %v2154_v55 = vsel %vm2147_vm9, %v2133_v53, 0.0 }
 0x13e   :  { %2155 = vadd.xlane.f32.xlu0 %v2154_v55 }
 0x13f   :  { %v1571_v21 = vpop.f32.mrf.mxu2  ;;  %v1636_v22 = vpop.f32.mrf.mxu3 }
 0x140   :  { %v1572_v33 = vadd.f32 %v1571_v21, %v3448_v35  ;;  %v1637_v34 = vadd.f32 %v1636_v22, %v3450_v37  ;;  %v2132_v22 = vld [vmem:[%s3718_s1 + $0x8] sm:$0xff] }
 0x141   :  { %v2151_v26 = vsel %vm2147_vm9, %v2132_v22, 0.0 }
 0x142   :  { %v1696_v48 = vmax.f32 %v1572_v33, 0.0  ;;  %v1697_v50 = vmax.f32 %v1637_v34, 0.0  ;;  %2152 = vadd.xlane.f32.xlu2 %v2151_v26 }
 0x143   :  { %1950 = vmatmul.f32.gmra.mxu2 %v1680_v61  ;;  %2015 = vmatmul.f32.gmra.mxu3 %v1681_v62 }
 0x144   :  { %1820 = vmatmul.f32.gmra.mxu0 %v1678_v63  ;;  %1885 = vmatmul.f32.gmra.mxu1 %v1679_v0 }
 0x14b   :  { %1953 = vmatmul.f32.gmra.mxu2 %v1684_v42  ;;  %2018 = vmatmul.f32.gmra.mxu3 %v1685_v29  ;;  %v1444_v32 = vpop.f32.mrf.mxu0  ;;  %v1509_v38 = vpop.f32.mrf.mxu1  ;;  %v2212_v29 = vld [vmem:[#allocation2] sm:$0x1] }
 0x14c   :  { %1823 = vmatmul.f32.gmra.mxu0 %v1682_v5  ;;  %1888 = vmatmul.f32.gmra.mxu1 %v1683_v6  ;;  %v1445_v59 = vadd.f32 %v1444_v32, %v3453_v40  ;;  %v1510_v54 = vadd.f32 %v1509_v38, %v3455_v44  ;;  %v2135_v5 = vld [vmem:[%s3718_s1 + $0x20] sm:$0xff] }
 0x14d   :  { %2215 = vperm.xlu1 %2389, %v2212_v29   ;;  %v2160_v9 = vsel %vm2147_vm9, %v2135_v5, 0.0 }
 0x14e   :  { %v1698_v1 = vmax.f32 %v1445_v59, 0.0  ;;  %v1699_v2 = vmax.f32 %v1510_v54, 0.0  ;;  %2161 = vadd.xlane.f32.xlu0 %v2160_v9 }
 0x150   :  { %v1574_v46 = vpop.f32.mrf.mxu2  ;;  %v1639_v47 = vpop.f32.mrf.mxu3 }
 0x151   :  { %v1575_v57 = vadd.f32 %v1574_v46, %v3448_v35  ;;  %v1640_v58 = vadd.f32 %v1639_v47, %v3450_v37  ;;  %v2134_v46 = vld [vmem:[%s3718_s1 + $0x18] sm:$0xff] }
 0x153   :  { %1956 = vmatmul.f32.gmra.mxu2 %v1688_v13  ;;  %2021 = vmatmul.f32.gmra.mxu3 %v1689_v16  ;;  %v1700_v63 = vmax.f32 %v1575_v57, 0.0  ;;  %v1701_v0 = vmax.f32 %v1640_v58, 0.0  ;;  %v2137_v16 = vld [vmem:[%s3718_s1 + $0x30] sm:$0xff] }
 0x154   :  { %1826 = vmatmul.f32.gmra.mxu0 %v1686_v17  ;;  %1891 = vmatmul.f32.gmra.mxu1 %v1687_v18  ;;  %v2166_v19 = vsel %vm2147_vm9, %v2137_v16, 0.0 }
 0x156   :  { %2167 = vadd.xlane.f32.xlu0 %v2166_v19 }
 0x15b   :  { %1959 = vmatmul.f32.gmra.mxu2 %v1692_v27  ;;  %2024 = vmatmul.f32.gmra.mxu3 %v1693_v28  ;;  %v1447_v56 = vpop.f32.mrf.mxu0  ;;  %v1512_v43 = vpop.f32.mrf.mxu1  ;;  %v2139_v28 = vld [vmem:[%s3718_s1 + $0x40] sm:$0xff] }
 0x15c   :  { %1829 = vmatmul.f32.gmra.mxu0 %v1690_v30  ;;  %1894 = vmatmul.f32.gmra.mxu1 %v1691_v31  ;;  %v1448_v41 = vadd.f32 %v1447_v56, %v3453_v40  ;;  %v1513_v42 = vadd.f32 %v1512_v43, %v3455_v44  ;;  %v2172_v34 = vsel %vm2147_vm9, %v2139_v28, 0.0 }
 0x15e   :  { %v1702_v10 = vmax.f32 %v1448_v41, 0.0  ;;  %v1703_v11 = vmax.f32 %v1513_v42, 0.0  ;;  %2173 = vadd.xlane.f32.xlu0 %v2172_v34 }
 0x160   :  { %v1577_v61 = vpop.f32.mrf.mxu2  ;;  %v1642_v62 = vpop.f32.mrf.mxu3 }
 0x161   :  { %v1578_v3 = vadd.f32 %v1577_v61, %v3448_v35  ;;  %v1643_v4 = vadd.f32 %v1642_v62, %v3450_v37 }
 0x163   :  { %1962 = vmatmul.f32.gmra.mxu2 %v1696_v48  ;;  %2027 = vmatmul.f32.gmra.mxu3 %v1697_v50  ;;  %v1704_v6 = vmax.f32 %v1578_v3, 0.0  ;;  %v1705_v7 = vmax.f32 %v1643_v4, 0.0 }
 0x164   :  { %1832 = vmatmul.f32.gmra.mxu0 %v1694_v51  ;;  %1897 = vmatmul.f32.gmra.mxu1 %v1695_v52  ;;  %v2157_v51 = vsel %vm2147_vm9, %v2134_v46, 0.0  ;;  %v2136_v52 = vld [vmem:[%s3718_s1 + $0x28] sm:$0xff] }
 0x165   :  { %2158 = vadd.xlane.f32.xlu2 %v2157_v51  ;;  %v2163_v53 = vsel %vm2147_vm9, %v2136_v52, 0.0 }
 0x16a   :  { %v1450_v36 = vpop.f32.mrf.mxu0  ;;  %v1515_v8 = vpop.f32.mrf.mxu1 }
 0x16b   :  { %1965 = vmatmul.f32.gmra.mxu2 %v1700_v63  ;;  %2030 = vmatmul.f32.gmra.mxu3 %v1701_v0  ;;  %v1451_v17 = vadd.f32 %v1450_v36, %v3453_v40  ;;  %v1516_v18 = vadd.f32 %v1515_v8, %v3455_v44 }
 0x16c   :  { %1835 = vmatmul.f32.gmra.mxu0 %v1698_v1  ;;  %1900 = vmatmul.f32.gmra.mxu1 %v1699_v2 }
 0x16d   :  { %v1706_v23 = vmax.f32 %v1451_v17, 0.0  ;;  %v1707_v24 = vmax.f32 %v1516_v18, 0.0  ;;  %2164 = vadd.xlane.f32.xlu2 %v2163_v53 }
 0x16f   :  { %v1580_v12 = vpop.f32.mrf.mxu2  ;;  %v1645_v14 = vpop.f32.mrf.mxu3 }
 0x170   :  { %v1581_v15 = vadd.f32 %v1580_v12, %v3448_v35  ;;  %v1646_v13 = vadd.f32 %v1645_v14, %v3450_v37 }
 0x172   :  { %v1708_v20 = vmax.f32 %v1581_v15, 0.0  ;;  %v1709_v21 = vmax.f32 %v1646_v13, 0.0 }
 0x173   :  { %1968 = vmatmul.f32.gmra.mxu2 %v1704_v6  ;;  %2033 = vmatmul.f32.gmra.mxu3 %v1705_v7  ;;  %v3588_v7 = vld [vmem:[%s3717_s6] ss:$0 sm:$0xff] }
 0x174   :  { %1838 = vmatmul.f32.gmra.mxu0 %v1702_v10  ;;  %1903 = vmatmul.f32.gmra.mxu1 %v1703_v11 }
 0x179   :  { %v1453_v25 = vpop.f32.mrf.mxu0  ;;  %v1518_v27 = vpop.f32.mrf.mxu1 }
 0x17a   :  { %v1454_v30 = vadd.f32 %v1453_v25, %v3453_v40  ;;  %v1519_v31 = vadd.f32 %v1518_v27, %v3455_v44 }
 0x17b   :  { %1971 = vmatmul.f32.gmra.mxu2 %v1708_v20  ;;  %2036 = vmatmul.f32.gmra.mxu3 %v1709_v21 }
 0x17c   :  { %1841 = vmatmul.f32.gmra.mxu0 %v1706_v23  ;;  %1906 = vmatmul.f32.gmra.mxu1 %v1707_v24  ;;  %v1710_v45 = vmax.f32 %v1454_v30, 0.0  ;;  %v1711_v50 = vmax.f32 %v1519_v31, 0.0 }
 0x17e   :  { %v1583_v32 = vpop.f32.mrf.mxu2  ;;  %v1648_v33 = vpop.f32.mrf.mxu3 }
 0x17f   :  { %v1584_v38 = vadd.f32 %v1583_v32, %v3448_v35  ;;  %v1649_v39 = vadd.f32 %v1648_v33, %v3450_v37 }
 0x181   :  { %v1712_v47 = vmax.f32 %v1584_v38, 0.0  ;;  %v1713_v48 = vmax.f32 %v1649_v39, 0.0 }
 0x183   :  { %1974 = vmatmul.f32.gmra.mxu2 %v1712_v47  ;;  %2039 = vmatmul.f32.gmra.mxu3 %v1713_v48 }
 0x184   :  { %1844 = vmatmul.f32.gmra.mxu0 %v1710_v45  ;;  %1909 = vmatmul.f32.gmra.mxu1 %v1711_v50 }
 0x189   :  { %v1456_v55 = vpop.f32.mrf.mxu0  ;;  %v1521_v57 = vpop.f32.mrf.mxu1 }
 0x18a   :  { %v1457_v58 = vadd.f32 %v1456_v55, %v3453_v40  ;;  %v1522_v59 = vadd.f32 %v1521_v57, %v3455_v44  ;;  %v2138_v40 = vld [vmem:[%s3718_s1 + $0x38] sm:$0xff] }
 0x18b   :  { %v2169_v44 = vsel %vm2147_vm9, %v2138_v40, 0.0 }
 0x18c   :  { %v1714_v54 = vmax.f32 %v1457_v58, 0.0  ;;  %v1715_v56 = vmax.f32 %v1522_v59, 0.0  ;;  %2170 = vadd.xlane.f32.xlu2 %v2169_v44 }
 0x18e   :  { %v1586_v60 = vpop.f32.mrf.mxu2  ;;  %v1651_v43 = vpop.f32.mrf.mxu3  ;;  %1847 = vmatmul.f32.gmra.mxu0 %v1714_v54  ;;  %1912 = vmatmul.f32.gmra.mxu1 %v1715_v56 }
 0x18f   :  { %v1587_v61 = vadd.f32 %v1586_v60, %v3448_v35  ;;  %v1652_v62 = vadd.f32 %v1651_v43, %v3450_v37  ;;  %v2140_v37 = vld [vmem:[%s3718_s1 + $0x48] sm:$0xff] }
 0x190   :  { %v2175_v29 = vsel %vm2147_vm9, %v2140_v37, 0.0 }
 0x191   :  { %v1716_v63 = vmax.f32 %v1587_v61, 0.0  ;;  %v1717_v0 = vmax.f32 %v1652_v62, 0.0  ;;  %v1803_v1 = vpop.f32.mrf.mxu0  ;;  %v1868_v2 = vpop.f32.mrf.mxu1 }
 0x192   :  { %v1804_v3 = vadd.f32 %v3572_v49, %v1803_v1 }
 0x193   :  { %1977 = vmatmul.f32.gmra.mxu2 %v1716_v63  ;;  %2042 = vmatmul.f32.gmra.mxu3 %v1717_v0 }
 0x194   :  { %v1869_v4 = vadd.f32 %v1868_v2, %v1804_v3  ;;  %2176 = vadd.xlane.f32.xlu2 %v2175_v29 }
 0x196   :  { %v1933_v41 = vpop.f32.mrf.mxu2  ;;  %v1998_v35 = vpop.f32.mrf.mxu3 }
 0x197   :  { %v1934_v42 = vadd.f32 %v1933_v41, %v1869_v4 }
 0x199   :  { %v1999_v36 = vadd.f32 %v1998_v35, %v1934_v42  ;;  %v1806_v5 = vpop.f32.mrf.mxu0  ;;  %v1871_v6 = vpop.f32.mrf.mxu1 }
 0x19a   :  { %v1807_v8 = vadd.f32 %v3572_v49, %v1806_v5 }
 0x19b   :  { %v2046_v9 = vmax.f32 %v1999_v36, 0.0 }
 0x19c   :  { %v1872_v10 = vadd.f32 %v1871_v6, %v1807_v8 }
 0x19d   :  { %v2066_v11 = vmul.f32 %v3588_v7, %v2046_v9 }
 0x19e   :  { %v1936_v12 = vpop.f32.mrf.mxu2  ;;  %v2001_v14 = vpop.f32.mrf.mxu3 }
 0x19f   :  { %v1937_v15 = vadd.f32 %v1936_v12, %v1872_v10  ;;  %v2083_v13 = vsel %vm2082_vm10, %v2066_v11, 0.0 }
 0x1a0   :  { %2084 = vadd.xlane.f32.xlu0 %v2083_v13 }
 0x1a1   :  { %v2002_v16 = vadd.f32 %v2001_v14, %v1937_v15  ;;  %v1809_v17 = vpop.f32.mrf.mxu0  ;;  %v1874_v18 = vpop.f32.mrf.mxu1 }
 0x1a2   :  { %v1810_v19 = vadd.f32 %v3572_v49, %v1809_v17 }
 0x1a3   :  { %v2047_v20 = vmax.f32 %v2002_v16, 0.0 }
 0x1a4   :  { %v1875_v21 = vadd.f32 %v1874_v18, %v1810_v19 }
 0x1a5   :  { %v2067_v22 = vmul.f32 %v3588_v7, %v2047_v20 }
 0x1a6   :  { %v1939_v23 = vpop.f32.mrf.mxu2  ;;  %v2004_v24 = vpop.f32.mrf.mxu3 }
 0x1a7   :  { %v1940_v25 = vadd.f32 %v1939_v23, %v1875_v21  ;;  %v2086_v26 = vsel %vm2082_vm10, %v2067_v22, 0.0 }
 0x1a8   :  { %2087 = vadd.xlane.f32.xlu0 %v2086_v26 }
 0x1a9   :  { %v2005_v27 = vadd.f32 %v2004_v24, %v1940_v25  ;;  %v1812_v28 = vpop.f32.mrf.mxu0  ;;  %v1877_v30 = vpop.f32.mrf.mxu1 }
 0x1aa   :  { %v1813_v31 = vadd.f32 %v3572_v49, %v1812_v28 }
 0x1ab   :  { %v2048_v32 = vmax.f32 %v2005_v27, 0.0 }
 0x1ac   :  { %v1878_v33 = vadd.f32 %v1877_v30, %v1813_v31 }
 0x1ad   :  { %v2068_v34 = vmul.f32 %v3588_v7, %v2048_v32 }
 0x1ae   :  { %v1942_v38 = vpop.f32.mrf.mxu2  ;;  %v2007_v39 = vpop.f32.mrf.mxu3 }
 0x1af   :  { %v1943_v45 = vadd.f32 %v1942_v38, %v1878_v33  ;;  %v2089_v46 = vsel %vm2082_vm10, %v2068_v34, 0.0 }
 0x1b0   :  { %2090 = vadd.xlane.f32.xlu1 %v2089_v46 }
 0x1b1   :  { %v2008_v47 = vadd.f32 %v2007_v39, %v1943_v45  ;;  %v1815_v48 = vpop.f32.mrf.mxu0  ;;  %v1880_v50 = vpop.f32.mrf.mxu1 }
 0x1b2   :  { %v1816_v51 = vadd.f32 %v3572_v49, %v1815_v48 }
 0x1b3   :  { %v2049_v52 = vmax.f32 %v2008_v47, 0.0 }
 0x1b4   :  { %v1881_v53 = vadd.f32 %v1880_v50, %v1816_v51 }
 0x1b5   :  { %v2069_v55 = vmul.f32 %v3588_v7, %v2049_v52 }
 0x1b6   :  { %v1945_v57 = vpop.f32.mrf.mxu2  ;;  %v2010_v58 = vpop.f32.mrf.mxu3 }
 0x1b7   :  { %v1946_v59 = vadd.f32 %v1945_v57, %v1881_v53  ;;  %v2092_v54 = vsel %vm2082_vm10, %v2069_v55, 0.0 }
 0x1b8   :  { %2093 = vadd.xlane.f32.xlu1 %v2092_v54 }
 0x1b9   :  { %v2011_v56 = vadd.f32 %v2010_v58, %v1946_v59  ;;  %v1818_v60 = vpop.f32.mrf.mxu0  ;;  %v1883_v43 = vpop.f32.mrf.mxu1 }
 0x1ba   :  { %v1819_v61 = vadd.f32 %v3572_v49, %v1818_v60 }
 0x1bb   :  { %v2050_v62 = vmax.f32 %v2011_v56, 0.0 }
 0x1bc   :  { %v1884_v40 = vadd.f32 %v1883_v43, %v1819_v61 }
 0x1bd   :  { %v2070_v44 = vmul.f32 %v3588_v7, %v2050_v62 }
 0x1be   :  { %v1948_v63 = vpop.f32.mrf.mxu2  ;;  %v2013_v0 = vpop.f32.mrf.mxu3 }
 0x1bf   :  { %v1949_v1 = vadd.f32 %v1948_v63, %v1884_v40  ;;  %v2095_v2 = vsel %vm2082_vm10, %v2070_v44, 0.0 }
 0x1c0   :  { %2096 = vadd.xlane.f32.xlu2 %v2095_v2 }
 0x1c1   :  { %v2014_v3 = vadd.f32 %v2013_v0, %v1949_v1  ;;  %v1821_v4 = vpop.f32.mrf.mxu0  ;;  %v1886_v41 = vpop.f32.mrf.mxu1 }
 0x1c2   :  { %v1822_v35 = vadd.f32 %v3572_v49, %v1821_v4 }
 0x1c3   :  { %v2051_v42 = vmax.f32 %v2014_v3, 0.0  ;;  %v3622_v3 = vpop.xlane.xlu0 %2155 }
 0x1c4   :  { %v1887_v37 = vadd.f32 %v1886_v41, %v1822_v35 }
 0x1c5   :  { %v2071_v29 = vmul.f32 %v3588_v7, %v2051_v42 }
 0x1c6   :  { %v1951_v36 = vpop.f32.mrf.mxu2  ;;  %v2016_v5 = vpop.f32.mrf.mxu3 }
 0x1c7   :  { %v1952_v6 = vadd.f32 %v1951_v36, %v1887_v37  ;;  %v2098_v8 = vsel %vm2082_vm10, %v2071_v29, 0.0 }
 0x1c8   :  { %2099 = vadd.xlane.f32.xlu2 %v2098_v8 }
 0x1c9   :  { %v2017_v9 = vadd.f32 %v2016_v5, %v1952_v6  ;;  %v1824_v10 = vpop.f32.mrf.mxu0  ;;  %v1889_v11 = vpop.f32.mrf.mxu1 }
 0x1ca   :  { %v1825_v12 = vadd.f32 %v3572_v49, %v1824_v10 }
 0x1cb   :  { %v2052_v14 = vmax.f32 %v2017_v9, 0.0 }
 0x1cc   :  { %v1890_v15 = vadd.f32 %v1889_v11, %v1825_v12 }
 0x1cd   :  { %v2072_v13 = vmul.f32 %v3588_v7, %v2052_v14 }
 0x1ce   :  { %v1954_v16 = vpop.f32.mrf.mxu2  ;;  %v2019_v17 = vpop.f32.mrf.mxu3 }
 0x1cf   :  { %v1955_v18 = vadd.f32 %v1954_v16, %v1890_v15  ;;  %v2101_v19 = vsel %vm2082_vm10, %v2072_v13, 0.0  ;;  %v3628_v15 = vpop.xlane.xlu0 %2161 }
 0x1d0   :  { %2102 = vadd.xlane.f32.xlu0 %v2101_v19  ;;  %v2143_v19 = vld [vmem:[%s3718_s1 + $0x60] sm:$0xff] }
 0x1d1   :  { %v2020_v20 = vadd.f32 %v2019_v17, %v1955_v18  ;;  %v1827_v21 = vpop.f32.mrf.mxu0  ;;  %v1892_v22 = vpop.f32.mrf.mxu1 }
 0x1d2   :  { %v1828_v23 = vadd.f32 %v3572_v49, %v1827_v21 }
 0x1d3   :  { %v2053_v24 = vmax.f32 %v2020_v20, 0.0 }
 0x1d4   :  { %v1893_v25 = vadd.f32 %v1892_v22, %v1828_v23  ;;  %v2184_v22 = vsel %vm2147_vm9, %v2143_v19, 0.0 }
 0x1d5   :  { %v2073_v26 = vmul.f32 %v3588_v7, %v2053_v24 }
 0x1d6   :  { %v1957_v27 = vpop.f32.mrf.mxu2  ;;  %v2022_v28 = vpop.f32.mrf.mxu3 }
 0x1d7   :  { %v1958_v30 = vadd.f32 %v1957_v27, %v1893_v25  ;;  %v2104_v31 = vsel %vm2082_vm10, %v2073_v26, 0.0 }
 0x1d8   :  { %2105 = vadd.xlane.f32.xlu1 %v2104_v31 }
 0x1d9   :  { %v2023_v32 = vadd.f32 %v2022_v28, %v1958_v30  ;;  %v1830_v33 = vpop.f32.mrf.mxu0  ;;  %v1895_v34 = vpop.f32.mrf.mxu1 }
 0x1da   :  { %v1831_v38 = vadd.f32 %v3572_v49, %v1830_v33  ;;  %v2153_v28 = vpop.xlane.xlu2 %2152 }
 0x1db   :  { %v2054_v39 = vmax.f32 %v2023_v32, 0.0 }
 0x1dc   :  { %v1896_v45 = vadd.f32 %v1895_v34, %v1831_v38  ;;  %v2142_v34 = vld [vmem:[%s3718_s1 + $0x58] sm:$0xff] }
 0x1dd   :  { %v2074_v46 = vmul.f32 %v3588_v7, %v2054_v39  ;;  %v3641_v39 = vpop.xlane.xlu0 %2167 }
 0x1de   :  { %v1960_v47 = vpop.f32.mrf.mxu2  ;;  %v2025_v48 = vpop.f32.mrf.mxu3 }
 0x1df   :  { %v1961_v50 = vadd.f32 %v1960_v47, %v1896_v45  ;;  %v2107_v51 = vsel %vm2082_vm10, %v2074_v46, 0.0  ;;  %v2181_v47 = vsel %vm2147_vm9, %v2142_v34, 0.0 }
 0x1e0   :  { %2108 = vadd.xlane.f32.xlu2 %v2107_v51 }
 0x1e1   :  { %v2026_v52 = vadd.f32 %v2025_v48, %v1961_v50  ;;  %v1833_v53 = vpop.f32.mrf.mxu0  ;;  %v1898_v55 = vpop.f32.mrf.mxu1 }
 0x1e2   :  { %v1834_v57 = vadd.f32 %v3572_v49, %v1833_v53 }
 0x1e3   :  { %v2055_v58 = vmax.f32 %v2026_v52, 0.0 }
 0x1e4   :  { %v1899_v59 = vadd.f32 %v1898_v55, %v1834_v57  ;;  %v2141_v55 = vld [vmem:[%s3718_s1 + $0x50] sm:$0xff] }
 0x1e5   :  { %v2075_v54 = vmul.f32 %v3588_v7, %v2055_v58  ;;  %v2144_v58 = vld [vmem:[%s3718_s1 + $0x68] sm:$0xff] }
 0x1e6   :  { %v1963_v56 = vpop.f32.mrf.mxu2  ;;  %v2028_v60 = vpop.f32.mrf.mxu3 }
 0x1e7   :  { %v1964_v43 = vadd.f32 %v1963_v56, %v1899_v59  ;;  %v2110_v61 = vsel %vm2082_vm10, %v2075_v54, 0.0  ;;  %v2159_v59 = vpop.xlane.xlu2 %2158  ;;  %v3652_v56 = vpop.xlane.xlu0 %2173 }
 0x1e8   :  { %2111 = vadd.xlane.f32.xlu0 %v2110_v61  ;;  %v2187_v61 = vsel %vm2147_vm9, %v2144_v58, 0.0 }
 0x1e9   :  { %v2029_v62 = vadd.f32 %v2028_v60, %v1964_v43  ;;  %v1836_v40 = vpop.f32.mrf.mxu0  ;;  %v1901_v44 = vpop.f32.mrf.mxu1  ;;  %v2178_v43 = vsel %vm2147_vm9, %v2141_v55, 0.0 }
 0x1ea   :  { %v1837_v63 = vadd.f32 %v3572_v49, %v1836_v40 }
 0x1eb   :  { %v2056_v0 = vmax.f32 %v2029_v62, 0.0 }
 0x1ec   :  { %v1902_v1 = vadd.f32 %v1901_v44, %v1837_v63  ;;  %v2150_v63 = vpop.xlane.xlu1 %2149 }
 0x1ed   :  { %v2076_v2 = vmul.f32 %v3588_v7, %v2056_v0  ;;  %v2145_v0 = vld [vmem:[%s3718_s1 + $0x70] sm:$0xff] }
 0x1ee   :  { %v1966_v4 = vpop.f32.mrf.mxu2  ;;  %v2031_v41 = vpop.f32.mrf.mxu3 }
 0x1ef   :  { %v1967_v35 = vadd.f32 %v1966_v4, %v1902_v1  ;;  %v2113_v42 = vsel %vm2082_vm10, %v2076_v2, 0.0  ;;  %v2190_v2 = vsel %vm2147_vm9, %v2145_v0, 0.0  ;;  %v2165_v4 = vpop.xlane.xlu2 %2164 }
 0x1f0   :  { %2114 = vadd.xlane.f32.xlu1 %v2113_v42 }
 0x1f1   :  { %v2032_v37 = vadd.f32 %v2031_v41, %v1967_v35  ;;  %v1839_v29 = vpop.f32.mrf.mxu0  ;;  %v1904_v36 = vpop.f32.mrf.mxu1 }
 0x1f2   :  { %v1840_v5 = vadd.f32 %v3572_v49, %v1839_v29 }
 0x1f3   :  { %v2057_v6 = vmax.f32 %v2032_v37, 0.0 }
 0x1f4   :  { %v1905_v8 = vadd.f32 %v1904_v36, %v1840_v5  ;;  %v2216_v36 = vpop.permute.xlu1 %2215 }
 0x1f5   :  { %v2077_v9 = vmul.f32 %v3588_v7, %v2057_v6 }
 0x1f6   :  { %v1969_v10 = vpop.f32.mrf.mxu2  ;;  %v2034_v11 = vpop.f32.mrf.mxu3 }
 0x1f7   :  { %v1970_v12 = vadd.f32 %v1969_v10, %v1905_v8  ;;  %v2116_v14 = vsel %vm2082_vm10, %v2077_v9, 0.0  ;;  %v2251_v10 = vlaneseq }
 0x1f8   :  { %2117 = vadd.xlane.f32.xlu2 %v2116_v14 }
 0x1f9   :  { %v2035_v13 = vadd.f32 %v2034_v11, %v1970_v12  ;;  %v1842_v16 = vpop.f32.mrf.mxu0  ;;  %v1907_v17 = vpop.f32.mrf.mxu1  ;;  %v2146_v11 = vld [vmem:[%s3718_s1 + $0x78] sm:$0xff] }
 0x1fa   :  { %v1843_v18 = vadd.f32 %v3572_v49, %v1842_v16 }
 0x1fb   :  { %v2058_v20 = vmax.f32 %v2035_v13, 0.0  ;;  %v2193_v13 = vsel %vm2147_vm9, %v2146_v11, 0.0  ;;  %vm2312_vm9 = vcmask 1048512  }
 0x1fc   :  { %v1908_v21 = vadd.f32 %v1907_v17, %v1843_v18  ;;  %v3670_v17 = vperm.slane %v2216_v36, 0  ;;  %v3672_v18 = vand.u32 127, %v2251_v10 }
 0x1fd   :  { %v2078_v23 = vmul.f32 %v3588_v7, %v2058_v20 }
 0x1fe   :  { %v1972_v24 = vpop.f32.mrf.mxu2  ;;  %v2037_v25 = vpop.f32.mrf.mxu3  ;;  %v2254_v19 = vadd.s32 4294967288, %v3672_v18  ;;  %v2274_v58 = vadd.s32 4294967248, %v3672_v18 }
 0x1ff   :  { %v1973_v26 = vadd.f32 %v1972_v24, %v1908_v21  ;;  %v2119_v27 = vsel %vm2082_vm10, %v2078_v23, 0.0  ;;  %v2171_v8 = vpop.xlane.xlu2 %2170  ;;  %v2258_v21 = vadd.s32 4294967280, %v3672_v18 }
 0x200   :  { %2185 = vadd.xlane.f32.xlu2 %v2184_v22  ;;  %2120 = vadd.xlane.f32.xlu0 %v2119_v27 }
 0x201   :  { %v2038_v30 = vadd.f32 %v2037_v25, %v1973_v26  ;;  %v1845_v31 = vpop.f32.mrf.mxu0  ;;  %v1910_v32 = vpop.f32.mrf.mxu1 }
 0x202   :  { %v1846_v33 = vadd.f32 %v3572_v49, %v1845_v31 }
 0x203   :  { %v2059_v38 = vmax.f32 %v2038_v30, 0.0 }
 0x204   :  { %v1911_v45 = vadd.f32 %v1910_v32, %v1846_v33 }
 0x205   :  { %v2079_v46 = vmul.f32 %v3588_v7, %v2059_v38 }
 0x206   :  { %v1975_v48 = vpop.f32.mrf.mxu2  ;;  %v2040_v50 = vpop.f32.mrf.mxu3 }
 0x207   :  { %v1976_v51 = vadd.f32 %v1975_v48, %v1911_v45  ;;  %v2122_v52 = vsel %vm2082_vm10, %v2079_v46, 0.0  ;;  %v2177_v23 = vpop.xlane.xlu2 %2176 }
 0x208   :  { %2123 = vadd.xlane.f32.xlu1 %v2122_v52  ;;  %2182 = vadd.xlane.f32.xlu0 %v2181_v47  ;;  %v2270_v52 = vadd.s32 4294967256, %v3672_v18 }
 0x209   :  { %v2041_v53 = vadd.f32 %v2040_v50, %v1976_v51  ;;  %v2266_v50 = vadd.s32 4294967264, %v3672_v18 }
 0x20b   :  { %v2060_v57 = vmax.f32 %v2041_v53, 0.0  ;;  %v1848_v54 = vpop.f32.mrf.mxu0  ;;  %v1913_v44 = vpop.f32.mrf.mxu1 }
 0x20c   :  { %v1849_v62 = vadd.f32 %v3572_v49, %v1848_v54 }
 0x20d   :  { %v2080_v60 = vmul.f32 %v3588_v7, %v2060_v57 }
 0x20e   :  { %v1914_v1 = vadd.f32 %v1913_v44, %v1849_v62 }
 0x20f   :  { %v2125_v40 = vsel %vm2082_vm10, %v2080_v60, 0.0 }
 0x210   :  { %2126 = vadd.xlane.f32.xlu2 %v2125_v40  ;;  %2179 = vadd.xlane.f32.xlu1 %v2178_v43 }
 0x211   :  { %2188 = vadd.xlane.f32.xlu0 %v2187_v61 }
 0x213   :  { %v2085_v37 = vpop.xlane.xlu0 %2084 }
 0x216   :  { %v1978_v41 = vpop.f32.mrf.mxu2  ;;  %v2043_v35 = vpop.f32.mrf.mxu3 }
 0x217   :  { %v1979_v42 = vadd.f32 %v1978_v41, %v1914_v1 }
 0x218   :  { %2191 = vadd.xlane.f32.xlu2 %v2190_v2  ;;  %v2282_v2 = vadd.s32 4294967232, %v3672_v18 }
 0x219   :  { %v2044_v49 = vadd.f32 %v2043_v35, %v1979_v42 }
 0x21b   :  { %v2061_v29 = vmax.f32 %v2044_v49, 0.0  ;;  %v2088_v9 = vpop.xlane.xlu0 %2087 }
 0x21c   :  { %v2197_v14 = vadd.f32 %v2153_v28, %v2088_v9 }
 0x21d   :  { %v2081_v5 = vmul.f32 %v3588_v7, %v2061_v29  ;;  %v2196_v7 = vadd.f32 %v2150_v63, %v2085_v37  ;;  %v2278_v63 = vadd.s32 4294967240, %v3672_v18 }
 0x21e   :  { %v2220_v20 = vadd.f32 %v3670_v17, %v2197_v14 }
 0x21f   :  { %v2128_v6 = vsel %vm2082_vm10, %v2081_v5, 0.0  ;;  %v2219_v24 = vadd.f32 %v3670_v17, %v2196_v7  ;;  %v2290_v7 = vadd.s32 4294967216, %v3672_v18 }
 0x220   :  { %2129 = vadd.xlane.f32.xlu0 %v2128_v6  ;;  %v2255_v26 = vperm.slane %v2220_v20, %v2254_v19 }
 0x221   :  { %v2253_v30 = vperm.slane %v2219_v24, %v3672_v18 }
 0x223   :  { %v2091_v12 = vpop.xlane.xlu1 %2090  ;;  %v2257_v32 = vsel %vm2256_vm11, %v2255_v26, %v2253_v30 }
 0x224   :  { %v2198_v16 = vadd.f32 %v3622_v3, %v2091_v12  ;;  %v2262_v3 = vadd.s32 4294967272, %v3672_v18 }
 0x226   :  { %v2221_v22 = vadd.f32 %v3670_v17, %v2198_v16 }
 0x228   :  { %2194 = vadd.xlane.f32.xlu0 %v2193_v13  ;;  %v2259_v28 = vperm.slane %v2221_v22, %v2258_v21  ;;  %v2286_v13 = vadd.s32 4294967224, %v3672_v18 }
 0x22a   :  { %v2261_v34 = vsel %vm2260_vm12, %v2259_v28, %v2257_v32 }
 0x22b   :  { %v2094_v25 = vpop.xlane.xlu1 %2093 }
 0x22c   :  { %v2199_v27 = vadd.f32 %v2159_v59, %v2094_v25 }
 0x22e   :  { %v2222_v31 = vadd.f32 %v3670_v17, %v2199_v27 }
 0x230   :  { %v2263_v33 = vperm.slane %v2222_v31, %v2262_v3  ;;  %v2294_v3 = vadd.s32 4294967208, %v3672_v18  ;;  %v2298_v31 = vadd.s32 4294967200, %v3672_v18 }
 0x232   :  { %v2265_v38 = vsel %vm2264_vm13, %v2263_v33, %v2261_v34 }
 0x233   :  { %v2097_v45 = vpop.xlane.xlu2 %2096 }
 0x234   :  { %v2200_v47 = vadd.f32 %v3628_v15, %v2097_v45 }
 0x236   :  { %v2223_v51 = vadd.f32 %v3670_v17, %v2200_v47  ;;  %v2302_v47 = vadd.s32 4294967192, %v3672_v18 }
 0x238   :  { %v2267_v57 = vperm.slane %v2223_v51, %v2266_v50 }
 0x23a   :  { %v2269_v60 = vsel %vm2268_vm14, %v2267_v57, %v2265_v38  ;;  %v2306_v38 = vadd.s32 4294967184, %v3672_v18 }
 0x23b   :  { %v2100_v46 = vpop.xlane.xlu2 %2099 }
 0x23c   :  { %v2201_v48 = vadd.f32 %v2165_v4, %v2100_v46 }
 0x23e   :  { %v2224_v53 = vadd.f32 %v3670_v17, %v2201_v48 }
 0x240   :  { %v2271_v54 = vperm.slane %v2224_v53, %v2270_v52  ;;  %v2310_v52 = vadd.s32 4294967176, %v3672_v18 }
 0x242   :  { %v2273_v61 = vsel %vm2272_vm15, %v2271_v54, %v2269_v60 }
 0x243   :  { %v2103_v55 = vpop.xlane.xlu0 %2102 }
 0x244   :  { %v2202_v59 = vadd.f32 %v3641_v39, %v2103_v55 }
 0x246   :  { %v2225_v15 = vadd.f32 %v3670_v17, %v2202_v59 }
 0x248   :  { %v2275_v43 = vperm.slane %v2225_v15, %v2274_v58 }
 0x24a   :  { %v2277_v62 = vsel %vm2276_vm0, %v2275_v43, %v2273_v61 }
 0x24b   :  { %v2106_v40 = vpop.xlane.xlu1 %2105 }
 0x24c   :  { %v2203_v44 = vadd.f32 %v2171_v8, %v2106_v40 }
 0x24e   :  { %v2226_v0 = vadd.f32 %v3670_v17, %v2203_v44 }
 0x250   :  { %v2279_v4 = vperm.slane %v2226_v0, %v2278_v63 }
 0x252   :  { %v2281_v42 = vsel %vm2280_vm1, %v2279_v4, %v2277_v62 }
 0x253   :  { %v2109_v1 = vpop.xlane.xlu2 %2108 }
 0x254   :  { %v2204_v39 = vadd.f32 %v3652_v56, %v2109_v1 }
 0x256   :  { %v2227_v41 = vadd.f32 %v3670_v17, %v2204_v39 }
 0x258   :  { %v2283_v35 = vperm.slane %v2227_v41, %v2282_v2 }
 0x25a   :  { %v2285_v37 = vsel %vm2284_vm2, %v2283_v35, %v2281_v42 }
 0x25b   :  { %v2112_v49 = vpop.xlane.xlu0 %2111 }
 0x25c   :  { %v2205_v14 = vadd.f32 %v2177_v23, %v2112_v49 }
 0x25e   :  { %v2228_v16 = vadd.f32 %v3670_v17, %v2205_v14 }
 0x260   :  { %v2287_v21 = vperm.slane %v2228_v16, %v2286_v13 }
 0x262   :  { %v2289_v28 = vsel %vm2288_vm3, %v2287_v21, %v2285_v37 }
 0x263   :  { %v2115_v36 = vpop.xlane.xlu1 %2114 }
 0x26b   :  { %v2118_v5 = vpop.xlane.xlu2 %2117 }
 0x273   :  { %v2121_v29 = vpop.xlane.xlu0 %2120  ;;  %v2186_v9 = vpop.xlane.xlu2 %2185 }
 0x274   :  { %v2208_v24 = vadd.f32 %v2186_v9, %v2121_v29 }
 0x276   :  { %v2231_v32 = vadd.f32 %v3670_v17, %v2208_v24 }
 0x278   :  { %v2299_v50 = vperm.slane %v2231_v32, %v2298_v31 }
 0x27b   :  { %v2124_v6 = vpop.xlane.xlu1 %2123  ;;  %v2183_v8 = vpop.xlane.xlu0 %2182 }
 0x27c   :  { %v2207_v20 = vadd.f32 %v2183_v8, %v2118_v5 }
 0x27e   :  { %v2230_v23 = vadd.f32 %v3670_v17, %v2207_v20 }
 0x280   :  { %v2295_v34 = vperm.slane %v2230_v23, %v2294_v3 }
 0x283   :  { %v2127_v10 = vpop.xlane.xlu2 %2126  ;;  %v2180_v11 = vpop.xlane.xlu1 %2179 }
 0x284   :  { %v2189_v12 = vpop.xlane.xlu0 %2188  ;;  %v2206_v56 = vadd.f32 %v2180_v11, %v2115_v36 }
 0x285   :  { %v2209_v30 = vadd.f32 %v2189_v12, %v2124_v6 }
 0x286   :  { %v2229_v19 = vadd.f32 %v3670_v17, %v2206_v56 }
 0x287   :  { %v2232_v48 = vadd.f32 %v3670_v17, %v2209_v30 }
 0x288   :  { %v2291_v25 = vperm.slane %v2229_v19, %v2290_v7 }
 0x289   :  { %v2303_v58 = vperm.slane %v2232_v48, %v2302_v47 }
 0x28a   :  { %v2293_v33 = vsel %vm2292_vm4, %v2291_v25, %v2289_v28 }
 0x28b   :  { %v2192_v22 = vpop.xlane.xlu2 %2191  ;;  %v2297_v46 = vsel %vm2296_vm5, %v2295_v34, %v2293_v33 }
 0x28c   :  { %v2210_v27 = vadd.f32 %v2192_v22, %v2127_v10  ;;  %v2301_v55 = vsel %vm2300_vm6, %v2299_v50, %v2297_v46 }
 0x28d   :  { %v2305_v54 = vsel %vm2304_vm7, %v2303_v58, %v2301_v55 }
 0x28e   :  { %v2233_v45 = vadd.f32 %v3670_v17, %v2210_v27 }
 0x290   :  { %v2307_v57 = vperm.slane %v2233_v45, %v2306_v38 }
 0x292   :  { %v2309_v60 = vsel %vm2308_vm8, %v2307_v57, %v2305_v54 }
 0x293   :  { %v2130_v26 = vpop.xlane.xlu0 %2129 }
 0x29b   :  { %v2195_v51 = vpop.xlane.xlu0 %2194 }
 0x29c   :  { %v2211_v53 = vadd.f32 %v2195_v51, %v2130_v26 }
 0x29e   :  { %v2234_v59 = vadd.f32 %v3670_v17, %v2211_v53 }
 0x2a0   :  { %v2311_v15 = vperm.slane %v2234_v59, %v2310_v52 }
 0x2a2   :  { %v2313_v43 = vsel %vm2312_vm9, %v2311_v15, %v2309_v60 }
 0x2a3   :  { %2315 = vst [vmem:[%s3720_s8] sm:$0x1] %v2313_v43 }

</bundles_post_ra>
